<compile_context>
chip_gen: v5e
topology: v5e:2x2
jax: 0.10.0
libtpu: 0.0.40
codegen_flags: <defaults>
</compile_context>

<pallas_src>
import math

import jax
import jax.numpy as jnp
from jax.experimental import pallas as pl
from jax.experimental.pallas import tpu as pltpu


def _round_up(x, m):
    return ((x + m - 1) // m) * m


def edgnn_kernel(dst_ref, msg_ref, hn_ref, w_msg_ref, w_self_ref, b_ref, out_ref):
    """Grid = (node tiles i, edge tiles k); k is the reduction axis.

    dst_ref   : [1, TE]        destination node index for each edge of this tile (int32)
    msg_ref   : [TE, Dn+De]    concat([hn_in[src[e]], he[e]]) for this edge tile (f32)
    hn_ref    : [TN, Dn]       node features for this node tile (self term)
    w_msg_ref : [Dn+De, F_pad] message weight (lane dim padded to 128)
    w_self_ref: [Dn,    F_pad] self weight
    b_ref     : [1,     F_pad] bias
    out_ref   : [TN, F_pad]    f32 output block, resident across k => accumulator
    """
    i = pl.program_id(0)
    k = pl.program_id(1)
    tn = out_ref.shape[0]
    te = msg_ref.shape[0]

    @pl.when(k == 0)
    def _init():
        out_ref[...] = jnp.zeros_like(out_ref)

    # Per-edge message projected straight into output space: [TE, F_pad].
    # (Reassociation: project before the scatter so the incidence is read once.)
    edge_term = jnp.dot(msg_ref[...], w_msg_ref[...],
                        preferred_element_type=jnp.float32)

    # Destination incidence built on the fly (VPU, overlaps the MXU) instead of
    # streaming an O(N*E) matrix from HBM.  Padded edges carry dst = -1 and
    # never match a node row.
    row_ids = jax.lax.broadcasted_iota(jnp.int32, (tn, te), 0) + i * tn
    dinc = (dst_ref[...] == row_ids).astype(jnp.float32)            # [TN, TE]

    # Scatter-sum onto the destination nodes of this node tile.
    out_ref[...] += jnp.dot(dinc, edge_term, preferred_element_type=jnp.float32)

    @pl.when(k == pl.num_programs(1) - 1)
    def _finalize():
        out_ref[...] += (
            jnp.dot(hn_ref[...], w_self_ref[...],
                    preferred_element_type=jnp.float32)
            + b_ref[...])


def edgnn_forward(node_features, edge_features, src, dst, weight, bias,
                  *, tile_n=None, tile_e=None):
    """node_features [N,Dn], edge_features [E,De], src/dst [E] int32,
    weight [out_feats, 2*Dn+De] (PyTorch Linear layout), bias [out_feats]."""
    N, Dn = node_features.shape
    E, De = edge_features.shape
    F = weight.shape[0]
    assert weight.shape[1] == 2 * Dn + De

    # Node tile multiple of 8 sublanes, edge tile multiple of 128 lanes.
    if tile_n is None:
        tile_n = min(128, _round_up(N, 8))
    if tile_e is None:
        tile_e = min(512, _round_up(E, 128))
    N_pad = _round_up(N, tile_n)
    E_pad = _round_up(E, tile_e)
    F_pad = _round_up(max(F, 128), 128)          # lane-dense output / weights

    f32 = jnp.float32

    # gnn_msg: cheap O(E*(Dn+De)) gather + concat in the wrapper; padded rows are 0.
    msg_feat = jnp.concatenate(
        [node_features.astype(f32)[src], edge_features.astype(f32)], axis=1)
    msg_feat = jnp.pad(msg_feat, ((0, E_pad - E), (0, 0)))           # [E_pad, Dn+De]
    hn = jnp.pad(node_features.astype(f32), ((0, N_pad - N), (0, 0)))

    # Destination indices only (the incidence matrix is rebuilt in-kernel).
    dst_idx = jnp.pad(dst.astype(jnp.int32), (0, E_pad - E),
                      constant_values=-1)[None, :]                   # [1, E_pad]

    # Split the PyTorch Linear weight by the concat order [hn | h_msg_node | h_msg_edge]
    # and pad the output (lane) dim to a multiple of 128.
    w_t = weight.astype(f32).T                                       # [2*Dn+De, F]
    pad_f = ((0, 0), (0, F_pad - F))
    w_self = jnp.pad(w_t[:Dn], pad_f)                                # [Dn, F_pad]
    w_msg = jnp.pad(w_t[Dn:], pad_f)                                 # [Dn+De, F_pad]
    b = jnp.pad(bias.astype(f32).reshape(1, F), pad_f)               # [1, F_pad]

    grid = (N_pad // tile_n, E_pad // tile_e)

    out = pl.pallas_call(
        edgnn_kernel,
        out_shape=jax.ShapeDtypeStruct((N_pad, F_pad), jnp.float32),
        grid_spec=pltpu.PrefetchScalarGridSpec(
            num_scalar_prefetch=0,
            grid=grid,
            in_specs=[
                pl.BlockSpec((1, tile_e), lambda i, k: (0, k)),          # dst indices
                pl.BlockSpec((tile_e, Dn + De), lambda i, k: (k, 0)),    # msg features
                pl.BlockSpec((tile_n, Dn), lambda i, k: (i, 0)),         # hn (self term)
                pl.BlockSpec((Dn + De, F_pad), lambda i, k: (0, 0)),     # w_msg
                pl.BlockSpec((Dn, F_pad), lambda i, k: (0, 0)),          # w_self
                pl.BlockSpec((1, F_pad), lambda i, k: (0, 0)),           # bias
            ],
            out_specs=pl.BlockSpec((tile_n, F_pad), lambda i, k: (i, 0)),
        ),
        compiler_params=pltpu.CompilerParams(
            # node axis independent -> shards across both TensorCores on v7x;
            # edge axis is the accumulation/reduction axis.
            dimension_semantics=("parallel", "arbitrary"),
            vmem_limit_bytes=32 * 1024 * 1024,
        ),
    )(dst_idx, msg_feat, hn, w_msg, w_self, b)

    return out[:N, :F]


def edgnn_reference(node_features, edge_features, src, dst, weight, bias):
    N = node_features.shape[0]
    msg = jnp.concatenate([node_features[src], edge_features], axis=1)
    h_msg = jax.ops.segment_sum(msg, dst, num_segments=N)
    h = jnp.concatenate([node_features, h_msg], axis=1)
    return h @ weight.T + bias


if __name__ == "__main__":
    # Small deterministic problem, big enough that the (node, edge) grid has
    # multiple tiles on both axes and exercises the accumulator path.
    N, E = 256, 1024
    node_dim, edge_dim, out_feats = 16, 8, 32
    input_dim = 2 * node_dim + edge_dim

    key = jax.random.PRNGKey(0)
    k_hn, k_he, k_src, k_dst, k_w, k_b = jax.random.split(key, 6)

    node_features = jax.random.normal(k_hn, (N, node_dim), dtype=jnp.float32)
    edge_features = jax.random.normal(k_he, (E, edge_dim), dtype=jnp.float32)
    src = jax.random.randint(k_src, (E,), 0, N, dtype=jnp.int32)
    dst = jax.random.randint(k_dst, (E,), 0, N, dtype=jnp.int32)

    # Parameters (nn.Linear(input_dim, out_feats)): xavier_uniform weight,
    # uniform(-stdv, stdv) bias with stdv = 1/sqrt(input_dim).
    xavier_bound = math.sqrt(6.0 / (input_dim + out_feats))
    weight = jax.random.uniform(k_w, (out_feats, input_dim), jnp.float32,
                                -xavier_bound, xavier_bound)
    stdv = 1.0 / math.sqrt(input_dim)
    bias = jax.random.uniform(k_b, (out_feats,), jnp.float32, -stdv, stdv)

    out = edgnn_forward(node_features, edge_features, src, dst, weight, bias)
    out = jax.block_until_ready(out)

    ref = edgnn_reference(node_features, edge_features, src, dst, weight, bias)
    assert out.shape == (N, out_feats)
    max_err = float(jnp.max(jnp.abs(out - ref)))
    assert jnp.allclose(out, ref, atol=1e-3, rtol=1e-3), max_err
    print("KERNEL_OK")
</pallas_src>

<mosaic_0001>
module attributes {stable_mosaic.version = 11 : i64} {
  func.func @edgnn_kernel(%arg0: i32, %arg1: i32, %arg2: memref<1x512xi32, #tpu.memory_space<vmem>>, %arg3: memref<512x24xf32, #tpu.memory_space<vmem>>, %arg4: memref<128x16xf32, #tpu.memory_space<vmem>>, %arg5: memref<24x128xf32, #tpu.memory_space<vmem>>, %arg6: memref<16x128xf32, #tpu.memory_space<vmem>>, %arg7: memref<1x128xf32, #tpu.memory_space<vmem>>, %arg8: memref<128x128xf32, #tpu.memory_space<vmem>>) attributes {dimension_semantics = [#tpu.dimension_semantics<parallel>, #tpu.dimension_semantics<arbitrary>], iteration_bounds = array<i64: 2, 2>, scalar_prefetch = 0 : i64, scratch_operands = 0 : i64, tpu.core_type = #tpu.core_type<tc>, window_params = [{transform_indices = @transform_0, window_bounds = array<i64: 1, 512>}, {transform_indices = @transform_1, window_bounds = array<i64: 512, 24>}, {transform_indices = @transform_2, window_bounds = array<i64: 128, 16>}, {pipeline_mode = #tpu.pipeline_mode<synchronous>, transform_indices = @transform_3, window_bounds = array<i64: 24, 128>}, {pipeline_mode = #tpu.pipeline_mode<synchronous>, transform_indices = @transform_4, window_bounds = array<i64: 16, 128>}, {pipeline_mode = #tpu.pipeline_mode<synchronous>, transform_indices = @transform_5, window_bounds = array<i64: 1, 128>}, {transform_indices = @transform_6, window_bounds = array<i64: 128, 128>}]} {
    %c0_i32 = arith.constant 0 : i32
    %0 = arith.cmpi eq, %arg1, %c0_i32 : i32
    %1 = arith.extui %0 : i1 to i32
    %c0_i32_0 = arith.constant 0 : i32
    %2 = arith.cmpi ne, %1, %c0_i32_0 : i32
    scf.if %2 {
      %cst_12 = arith.constant 0.000000e+00 : f32
      %22 = vector.broadcast %cst_12 : f32 to vector<128x128xf32>
      %c0_13 = arith.constant 0 : index
      %c0_14 = arith.constant 0 : index
      %23 = vector.load %arg8[%c0_13, %c0_14] : memref<128x128xf32, #tpu.memory_space<vmem>>, vector<128x128xf32>
      tpu.vector_store %arg8[%c0_13, %c0_14], %22 {strides = array<i32>} : memref<128x128xf32, #tpu.memory_space<vmem>>, vector<128x128xf32>,
    } else {
    }
    %c0 = arith.constant 0 : index
    %c0_1 = arith.constant 0 : index
    %3 = vector.load %arg3[%c0, %c0_1] : memref<512x24xf32, #tpu.memory_space<vmem>>, vector<512x24xf32>
    %c0_2 = arith.constant 0 : index
    %c0_3 = arith.constant 0 : index
    %4 = vector.load %arg5[%c0_2, %c0_3] : memref<24x128xf32, #tpu.memory_space<vmem>>, vector<24x128xf32>
    %cst = arith.constant dense<0.000000e+00> : vector<512x128xf32>
    %5 = tpu.matmul %3, %4, %cst {dimension_numbers = #tpu.dot_dimension_numbers<[1], [0], [0], [1], [0, 0, 1, 1], [], []>} : vector<512x24xf32>, vector<24x128xf32>, vector<512x128xf32> -> vector<512x128xf32>
    %6 = tpu.iota {dimensions = array<i32: 0>} : vector<128x512xi32>
    %c128_i32 = arith.constant 128 : i32
    %7 = arith.muli %arg0, %c128_i32 : i32
    %8 = vector.broadcast %7 : i32 to vector<128x512xi32>
    %9 = arith.addi %6, %8 : vector<128x512xi32>
    %c0_4 = arith.constant 0 : index
    %c0_5 = arith.constant 0 : index
    %10 = vector.load %arg2[%c0_4, %c0_5] : memref<1x512xi32, #tpu.memory_space<vmem>>, vector<1x512xi32>
    %11 = vector.broadcast %10 : vector<1x512xi32> to vector<128x512xi32>
    %12 = arith.cmpi eq, %11, %9 : vector<128x512xi32>
    %13 = arith.extui %12 : vector<128x512xi1> to vector<128x512xi32>
    %14 = arith.sitofp %13 : vector<128x512xi32> to vector<128x512xf32>
    %c0_6 = arith.constant 0 : index
    %c0_7 = arith.constant 0 : index
    %15 = vector.load %arg8[%c0_6, %c0_7] : memref<128x128xf32, #tpu.memory_space<vmem>>, vector<128x128xf32>
    %cst_8 = arith.constant dense<0.000000e+00> : vector<128x128xf32>
    %16 = tpu.matmul %14, %5, %cst_8 {dimension_numbers = #tpu.dot_dimension_numbers<[1], [0], [0], [1], [0, 0, 1, 1], [], []>} : vector<128x512xf32>, vector<512x128xf32>, vector<128x128xf32> -> vector<128x128xf32>
    %17 = arith.addf %15, %16 : vector<128x128xf32>
    %c0_9 = arith.constant 0 : index
    %c0_10 = arith.constant 0 : index
    %18 = vector.load %arg8[%c0_9, %c0_10] : memref<128x128xf32, #tpu.memory_space<vmem>>, vector<128x128xf32>
    tpu.vector_store %arg8[%c0_9, %c0_10], %17 {strides = array<i32>} : memref<128x128xf32, #tpu.memory_space<vmem>>, vector<128x128xf32>,
    %c1_i32 = arith.constant 1 : i32
    %19 = arith.cmpi eq, %arg1, %c1_i32 : i32
    %20 = arith.extui %19 : i1 to i32
    %c0_i32_11 = arith.constant 0 : i32
    %21 = arith.cmpi ne, %20, %c0_i32_11 : i32
    scf.if %21 {
      %c0_12 = arith.constant 0 : index
      %c0_13 = arith.constant 0 : index
      %22 = vector.load %arg8[%c0_12, %c0_13] : memref<128x128xf32, #tpu.memory_space<vmem>>, vector<128x128xf32>
      %c0_14 = arith.constant 0 : index
      %c0_15 = arith.constant 0 : index
      %23 = vector.load %arg4[%c0_14, %c0_15] : memref<128x16xf32, #tpu.memory_space<vmem>>, vector<128x16xf32>
      %c0_16 = arith.constant 0 : index
      %c0_17 = arith.constant 0 : index
      %24 = vector.load %arg6[%c0_16, %c0_17] : memref<16x128xf32, #tpu.memory_space<vmem>>, vector<16x128xf32>
      %cst_18 = arith.constant dense<0.000000e+00> : vector<128x128xf32>
      %25 = tpu.matmul %23, %24, %cst_18 {dimension_numbers = #tpu.dot_dimension_numbers<[1], [0], [0], [1], [0, 0, 1, 1], [], []>} : vector<128x16xf32>, vector<16x128xf32>, vector<128x128xf32> -> vector<128x128xf32>
      %c0_19 = arith.constant 0 : index
      %c0_20 = arith.constant 0 : index
      %26 = vector.load %arg7[%c0_19, %c0_20] : memref<1x128xf32, #tpu.memory_space<vmem>>, vector<1x128xf32>
      %27 = vector.broadcast %26 : vector<1x128xf32> to vector<128x128xf32>
      %28 = arith.addf %25, %27 : vector<128x128xf32>
      %29 = arith.addf %22, %28 : vector<128x128xf32>
      %c0_21 = arith.constant 0 : index
      %c0_22 = arith.constant 0 : index
      %30 = vector.load %arg8[%c0_21, %c0_22] : memref<128x128xf32, #tpu.memory_space<vmem>>, vector<128x128xf32>
      tpu.vector_store %arg8[%c0_21, %c0_22], %29 {strides = array<i32>} : memref<128x128xf32, #tpu.memory_space<vmem>>, vector<128x128xf32>,
    } else {
    }
    return
  }
  func.func @transform_0(%arg0: i32, %arg1: i32) -> (i32, i32) {
    %c0_i32 = arith.constant 0 : i32
    %c0_i32_0 = arith.constant 0 : i32
    return %c0_i32, %arg1 : i32, i32
  }
  func.func @transform_1(%arg0: i32, %arg1: i32) -> (i32, i32) {
    %c0_i32 = arith.constant 0 : i32
    %c0_i32_0 = arith.constant 0 : i32
    return %arg1, %c0_i32 : i32, i32
  }
  func.func @transform_2(%arg0: i32, %arg1: i32) -> (i32, i32) {
    %c0_i32 = arith.constant 0 : i32
    %c0_i32_0 = arith.constant 0 : i32
    return %arg0, %c0_i32 : i32, i32
  }
  func.func @transform_3(%arg0: i32, %arg1: i32) -> (i32, i32) {
    %c0_i32 = arith.constant 0 : i32
    %c0_i32_0 = arith.constant 0 : i32
    %c0_i32_1 = arith.constant 0 : i32
    return %c0_i32, %c0_i32_0 : i32, i32
  }
  func.func @transform_4(%arg0: i32, %arg1: i32) -> (i32, i32) {
    %c0_i32 = arith.constant 0 : i32
    %c0_i32_0 = arith.constant 0 : i32
    %c0_i32_1 = arith.constant 0 : i32
    return %c0_i32, %c0_i32_0 : i32, i32
  }
  func.func @transform_5(%arg0: i32, %arg1: i32) -> (i32, i32) {
    %c0_i32 = arith.constant 0 : i32
    %c0_i32_0 = arith.constant 0 : i32
    %c0_i32_1 = arith.constant 0 : i32
    return %c0_i32, %c0_i32_0 : i32, i32
  }
  func.func @transform_6(%arg0: i32, %arg1: i32) -> (i32, i32) {
    %c0_i32 = arith.constant 0 : i32
    %c0_i32_0 = arith.constant 0 : i32
    return %arg0, %c0_i32 : i32, i32
  }
}

</mosaic_0001>

<bundles_post_ra>
// kernel: tpu_custom_call.1
= control target key start
LH: loop header
LB: loop body
LE: loop exit
PB: predicated region body
PF: predicated region fallthrough
CT: control target
= control target key end

     0   :  { %11 = vsyncpa [#allocation3], 0  ;;  %s2980_s0 = inlined_call_operand.vmem [shape: s32[1,1024], index: 0, kind: input, shape index: {}]   ;;  %s2981_s1 = inlined_call_operand.vmem [shape: f32[1024,24], index: 1, kind: input, shape index: {}]   ;;  %s2982_s2 = inlined_call_operand.vmem [shape: f32[256,16], index: 2, kind: input, shape index: {}]   ;;  %s2983_s3 = inlined_call_operand.vmem [shape: f32[24,128], index: 3, kind: input, shape index: {}]   ;;  %s2984_s4 = inlined_call_operand.vmem [shape: f32[16,128], index: 4, kind: input, shape index: {}]   ;;  %s2985_s5 = inlined_call_operand.vmem [shape: f32[1,128], index: 5, kind: input, shape index: {}]   ;;  %s2986_s6 = inlined_call_operand.hbm [shape: f32[256,128], index: 6, kind: output, shape index: {}]  }
   0x1   :  { %13 = vsyncpa [#allocation3 + $0x1], 0  ;;  %s2100_s21 = smov 0   ;;  %s2102_s22 = smov 0  }
   0x2   :  { %s2104_s23 = smov 0   ;;  %s2106_s24 = smov 0  }
   0x3   :  { %s2108_s25 = smov 0   ;;  %s2110_s26 = smov 0  }
   0x4   :  { %s2112_s27 = smov 0   ;;  %s2114_s28 = smov 0  }
   0x5 LB: > { %2991 = sst [smem:[#allocation5_spill]] %s2051_s26  ;;  %s1633_s29 = sadd.s32 4294967295, %s2059_s28   ;;  %s2059_s28 = sphi %s2114_s28, %s19_s28   ;;  %s2055_s27 = sphi %s2112_s27, %s3003_s27   ;;  %s2051_s26 = sphi %s2110_s26, %s3007_s26   ;;  %s2047_s25 = sphi %s2108_s25, %s3001_s25   ;;  %s2043_s24 = sphi %s2106_s24, %s3000_s24   ;;  %s2039_s23 = sphi %s2104_s23, %s3006_s23   ;;  %s2035_s22 = sphi %s2102_s22, %s3005_s22   ;;  %s2031_s21 = sphi %s2100_s21, %s3004_s21  }
   0x6   : > { %2992 = sst [smem:[#allocation6_spill]] %s2055_s27  ;;  %s1634_s30 = sadd.s32 4294967294, %s2059_s28  }
   0x7   : > { %s28_s7 = sadd.s32 1, %s2051_s26  ;;  %s31_s8 = sadd.s32 1, %s2055_s27 }
   0x8   : > { %p29_p0 = scmp.ge.s32.totalorder %s28_s7, 2  ;;  %p189_p1 = scmp.ne.s32.totalorder %s2039_s23, %s2035_s22 }
   0x9   : > { %p190_p2 = scmp.eq.s32.totalorder %s1633_s29, 3  ;;  %p195_p4 = scmp.ne.s32.totalorder %s2035_s22, %s2031_s21 }
   0xa   : > { %s3009_s7 = smov (%p29_p0, %s28_s7), 0  ;;  %s3011_s8 = smov (!%p29_p0, %s31_s8), %s2055_s27 }
   0xb   : > { %2993 = sst [smem:[#allocation7_spill]] %s3009_s7  ;;  %p2149_p3 = por %p190_p2, %p189_p1 }
   0xc   : > { %p33_p5 = scmp.ge.s32.totalorder %s3011_s8, 2  ;;  %p196_p6 = scmp.eq.s32.totalorder %s1634_s30, 3 }
   0xd   : > { %p1637_p7 = scmp.ge.s32.totalorder %s2059_s28, 1  ;;  %p249_p8 = scmp.lt.s32.totalorder %s2059_s28, 5 }
   0xe   : > { %s3013_s8 = smov (%p33_p5, %s3011_s8), 0  ;;  %p2159_p9 = por %p196_p6, %p195_p4 }
   0xf   : > { %2995 = sst [smem:[#allocation8_spill]] %s3013_s8  ;;  %p250_p10 = pnand %p1637_p7, %p249_p8 }
  0x10   : > { %s176_s11 = ssub.s32 %s2055_s27, %s3013_s8  ;;  %s179_s12 = sadd.s32 1, %s2039_s23 }
  0x11   : > { %p177_p11 = scmp.eq.s32.totalorder %s176_s11, 0  ;;  %253 = sbr.rel (%p250_p10) target bundleno = 904 (0x388), region = 44 }
  0x12   : > { %s2988_s14 = sand.u32 (!%p250_p10), 1, %s2035_s22   ;;  %s1639_s15 = sshll.u32 (!%p250_p10), %s2043_s24, 2 }
  0x13   : > { %s2167_s13 = scalar_select %p177_p11, %s2039_s23, %s179_s12  }
  0x14   : > { %s1638_s16 = sshll.u32 (!%p250_p10), %s2988_s14, 7  ;;  %p289_p12 = scmp.lt.s32.totalorder (!%p250_p10), %s1639_s15, 7 }
  0x15   : > { %2997 = sst [smem:[#allocation9_spill]] %s2167_s13  ;;  %s1640_s17 = sshll.u32 (!%p250_p10), %s2043_s24, 6 }
  0x16   : > { %s3015_s15 = smov (!%p289_p12, %s1639_s15), 7  ;;  %p294_p13 = scmp.lt.s32.totalorder %s1640_s17, 127 }
  0x17   : > { %s1642_s18 = sshll.u32 %s2047_s25, 4  ;;  %s291_s29 = scalar_lea.vmem %s2980_s0, %s3015_s15 }
  0x18   : > { %p300_p0 = scmp.lt.s32.totalorder %s1642_s18, 31  ;;  %s3017_s17 = smov (!%p294_p13, %s1640_s17), 127 }
  0x19   : > { %s1641_s30 = sshll.u32 %s3017_s17, 3  ;;  %s2191_s13 = scalar_lea.vmem [#allocation2], %s1638_s16 }
  0x1a   : > { %s3019_s18 = smov (!%p300_p0, %s1642_s18), 31  ;;  %s2184_s8 = scalar_lea.vmem %s2981_s1, %s1641_s30 }
  0x1b   : > { %s1643_s14 = sshll.u32 %s3019_s18, 3  ;;  %p1644_p1 = scmp.ne.s32.totalorder %s2043_s24, 0 }
  0x1c   : > { %s2189_s26 = scalar_lea.vmem %s2982_s2, %s1643_s14 }
  0x1d   : > { %309 = sbr.rel (%p1644_p1) target bundleno = 51 (0x33), region = 48 }
  0x22   : > { %v2061_v0 = vmov 0.0  }
  0x23   : > { %310 = vst [vmem:[%s2191_s13] sm:$0xff] %v2061_v0 }
  0x24   : > { %311 = vst [vmem:[%s2191_s13 + $0x8] sm:$0xff] %v2061_v0 }
  0x25   : > { %312 = vst [vmem:[%s2191_s13 + $0x10] sm:$0xff] %v2061_v0 }
  0x26   : > { %313 = vst [vmem:[%s2191_s13 + $0x18] sm:$0xff] %v2061_v0 }
  0x27   : > { %314 = vst [vmem:[%s2191_s13 + $0x20] sm:$0xff] %v2061_v0 }
  0x28   : > { %315 = vst [vmem:[%s2191_s13 + $0x28] sm:$0xff] %v2061_v0 }
  0x29   : > { %316 = vst [vmem:[%s2191_s13 + $0x30] sm:$0xff] %v2061_v0 }
  0x2a   : > { %317 = vst [vmem:[%s2191_s13 + $0x38] sm:$0xff] %v2061_v0 }
  0x2b   : > { %318 = vst [vmem:[%s2191_s13 + $0x40] sm:$0xff] %v2061_v0 }
  0x2c   : > { %319 = vst [vmem:[%s2191_s13 + $0x48] sm:$0xff] %v2061_v0 }
  0x2d   : > { %320 = vst [vmem:[%s2191_s13 + $0x50] sm:$0xff] %v2061_v0 }
  0x2e   : > { %321 = vst [vmem:[%s2191_s13 + $0x58] sm:$0xff] %v2061_v0 }
  0x2f   : > { %322 = vst [vmem:[%s2191_s13 + $0x60] sm:$0xff] %v2061_v0 }
  0x30   : > { %323 = vst [vmem:[%s2191_s13 + $0x68] sm:$0xff] %v2061_v0 }
  0x31   : > { %324 = vst [vmem:[%s2191_s13 + $0x70] sm:$0xff] %v2061_v0 }
  0x32   : > { %325 = vst [vmem:[%s2191_s13 + $0x78] sm:$0xff] %v2061_v0 }
  0x33 PF: > { %v392_v1 = vld [vmem:[%s2983_s3 + $0x10] sm:$0xff]  ;;  %v391_v2 = vld [vmem:[%s2983_s3 + $0x8] sm:$0xff]  ;;  %v390_v3 = vld [vmem:[%s2983_s3] sm:$0xff]  ;;  %vm393_vm0 = vcmask 195584   ;;  %s1709_s19 = sshll.u32 %s2047_s25, 7  ;;  %p1838_p2 = scmp.ne.s32.totalorder %s2043_s24, 1 }
  0x34   : > { %599 = vmatpush.msra.mxu0 %v392_v1  ;;  %1861 = vmatpush.msra.mxu2 %v392_v1  ;;  %v326_v4 = vld [vmem:[%s2184_s8] sm:$0xff]  ;;  %v360_v5 = vld [vmem:[%s2184_s8 + $0x110] sm:$0xff]  ;;  %v327_v6 = vld [vmem:[%s2184_s8 + $0x8] sm:$0xff] }
  0x35   : > { %1862 = vmatpush.msra.mxu3 %v392_v1  ;;  %v361_v7 = vld [vmem:[%s2184_s8 + $0x118] sm:$0xff]  ;;  %v328_v8 = vld [vmem:[%s2184_s8 + $0x10] sm:$0xff]  ;;  %v362_v9 = vld [vmem:[%s2184_s8 + $0x120] sm:$0xff] }
  0x36   : > { %600 = vmatpush.msra.mxu0 %v391_v2  ;;  %1863 = vmatpush.msra.mxu2 %v391_v2  ;;  %v377_v10 = vld [vmem:[%s2184_s8 + $0x198] sm:$0xff]  ;;  %v363_v12 = vld [vmem:[%s2184_s8 + $0x128] sm:$0xff]  ;;  %v378_v13 = vld [vmem:[%s2184_s8 + $0x1a0] sm:$0xff] }
  0x37   : > { %1864 = vmatpush.msra.mxu3 %v391_v2  ;;  %v329_v11 = vld [vmem:[%s2184_s8 + $0x18] sm:$0xff]  ;;  %v330_v14 = vld [vmem:[%s2184_s8 + $0x20] sm:$0xff]  ;;  %v364_v15 = vld [vmem:[%s2184_s8 + $0x130] sm:$0xff] }
  0x38   : > { %601 = vmatpush.msra.mxu0 %v390_v3  ;;  %1865 = vmatpush.msra.mxu2 %v390_v3  ;;  %v379_v16 = vld [vmem:[%s2184_s8 + $0x1a8] sm:$0xff]  ;;  %v365_v18 = vld [vmem:[%s2184_s8 + $0x138] sm:$0xff]  ;;  %v380_v19 = vld [vmem:[%s2184_s8 + $0x1b0] sm:$0xff] }
  0x39   : > { %1645 = vmatmul.msk.f32.vlgmr.msra.gmra.mxu0 %vm393_vm0, %v326_v4  ;;  %1679 = vmatmul.msk.f32.vlgmr.msra.gmra.mxu2 %vm393_vm0, %v360_v5  ;;  %v331_v17 = vld [vmem:[%s2184_s8 + $0x28] sm:$0xff]  ;;  %v332_v20 = vld [vmem:[%s2184_s8 + $0x30] sm:$0xff]  ;;  %v366_v21 = vld [vmem:[%s2184_s8 + $0x140] sm:$0xff] }
  0x3a   : > { %1866 = vmatpush.msra.mxu3 %v390_v3  ;;  %v381_v22 = vld [vmem:[%s2184_s8 + $0x1b8] sm:$0xff]  ;;  %v367_v24 = vld [vmem:[%s2184_s8 + $0x148] sm:$0xff]  ;;  %v382_v25 = vld [vmem:[%s2184_s8 + $0x1c0] sm:$0xff] }
  0x3b   : > { %1696 = vmatmul.msk.f32.vlgmr.msra.gmra.mxu3 %vm393_vm0, %v377_v10  ;;  %v333_v23 = vld [vmem:[%s2184_s8 + $0x38] sm:$0xff]  ;;  %v334_v26 = vld [vmem:[%s2184_s8 + $0x40] sm:$0xff]  ;;  %v368_v27 = vld [vmem:[%s2184_s8 + $0x150] sm:$0xff] }
  0x3c   : > { %v383_v28 = vld [vmem:[%s2184_s8 + $0x1c8] sm:$0xff]  ;;  %v369_v30 = vld [vmem:[%s2184_s8 + $0x158] sm:$0xff]  ;;  %v384_v31 = vld [vmem:[%s2184_s8 + $0x1d0] sm:$0xff] }
  0x3d   : > { %v335_v29 = vld [vmem:[%s2184_s8 + $0x48] sm:$0xff]  ;;  %v336_v32 = vld [vmem:[%s2184_s8 + $0x50] sm:$0xff]  ;;  %v370_v33 = vld [vmem:[%s2184_s8 + $0x160] sm:$0xff] }
  0x3e   : > { %v385_v34 = vld [vmem:[%s2184_s8 + $0x1d8] sm:$0xff]  ;;  %v371_v36 = vld [vmem:[%s2184_s8 + $0x168] sm:$0xff]  ;;  %v386_v37 = vld [vmem:[%s2184_s8 + $0x1e0] sm:$0xff] }
  0x3f   : > { %v337_v35 = vld [vmem:[%s2184_s8 + $0x58] sm:$0xff]  ;;  %v338_v38 = vld [vmem:[%s2184_s8 + $0x60] sm:$0xff]  ;;  %v372_v39 = vld [vmem:[%s2184_s8 + $0x170] sm:$0xff] }
  0x40   : > { %v387_v40 = vld [vmem:[%s2184_s8 + $0x1e8] sm:$0xff]  ;;  %v373_v42 = vld [vmem:[%s2184_s8 + $0x178] sm:$0xff]  ;;  %v388_v43 = vld [vmem:[%s2184_s8 + $0x1f0] sm:$0xff] }
  0x41   : > { %1646 = vmatmul.msk.f32.gmra.mxu0 %vm393_vm0, %v327_v6  ;;  %1680 = vmatmul.msk.f32.gmra.mxu2 %vm393_vm0, %v361_v7  ;;  %v339_v41 = vld [vmem:[%s2184_s8 + $0x68] sm:$0xff]  ;;  %v340_v44 = vld [vmem:[%s2184_s8 + $0x70] sm:$0xff]  ;;  %v389_v45 = vld [vmem:[%s2184_s8 + $0x1f8] sm:$0xff] }
  0x42   : > { %v341_v46 = vld [vmem:[%s2184_s8 + $0x78] sm:$0xff]  ;;  %v342_v48 = vld [vmem:[%s2184_s8 + $0x80] sm:$0xff]  ;;  %v343_v51 = vld [vmem:[%s2184_s8 + $0x88] sm:$0xff] }
  0x43   : > { %1697 = vmatmul.msk.f32.gmra.mxu3 %vm393_vm0, %v378_v13  ;;  %v344_v54 = vld [vmem:[%s2184_s8 + $0x90] sm:$0xff]  ;;  %v345_v57 = vld [vmem:[%s2184_s8 + $0x98] sm:$0xff]  ;;  %v346_v61 = vld [vmem:[%s2184_s8 + $0xa0] sm:$0xff] }
  0x44   : > { %v347_v0 = vld [vmem:[%s2184_s8 + $0xa8] sm:$0xff]  ;;  %v348_v4 = vld [vmem:[%s2184_s8 + $0xb0] sm:$0xff] }
  0x49   : > { %1647 = vmatmul.msk.f32.gmra.mxu0 %vm393_vm0, %v328_v8  ;;  %1681 = vmatmul.msk.f32.gmra.mxu2 %vm393_vm0, %v362_v9  ;;  %v349_v8 = vld [vmem:[%s2184_s8 + $0xb8] sm:$0xff] }
  0x4b   : > { %1698 = vmatmul.msk.f32.gmra.mxu3 %vm393_vm0, %v379_v16  ;;  %v351_v16 = vld [vmem:[%s2184_s8 + $0xc8] sm:$0xff] }
  0x51   : > { %1648 = vmatmul.msk.f32.gmra.mxu0 %vm393_vm0, %v329_v11  ;;  %1682 = vmatmul.msk.f32.gmra.mxu2 %vm393_vm0, %v363_v12  ;;  %v350_v12 = vld [vmem:[%s2184_s8 + $0xc0] sm:$0xff] }
  0x53   : > { %1699 = vmatmul.msk.f32.gmra.mxu3 %vm393_vm0, %v380_v19  ;;  %v352_v19 = vld [vmem:[%s2184_s8 + $0xd0] sm:$0xff] }
  0x59   : > { %1649 = vmatmul.msk.f32.gmra.mxu0 %vm393_vm0, %v330_v14  ;;  %1683 = vmatmul.msk.f32.gmra.mxu2 %vm393_vm0, %v364_v15 }
  0x5b   : > { %1700 = vmatmul.msk.f32.gmra.mxu3 %vm393_vm0, %v381_v22 }
  0x61   : > { %1650 = vmatmul.msk.f32.gmra.mxu0 %vm393_vm0, %v331_v17  ;;  %1684 = vmatmul.msk.f32.gmra.mxu2 %vm393_vm0, %v365_v18 }
  0x63   : > { %1701 = vmatmul.msk.f32.gmra.mxu3 %vm393_vm0, %v382_v25 }
  0x69   : > { %1651 = vmatmul.msk.f32.gmra.mxu0 %vm393_vm0, %v332_v20  ;;  %1685 = vmatmul.msk.f32.gmra.mxu2 %vm393_vm0, %v366_v21 }
  0x6b   : > { %1702 = vmatmul.msk.f32.gmra.mxu3 %vm393_vm0, %v383_v28 }
  0x71   : > { %1652 = vmatmul.msk.f32.gmra.mxu0 %vm393_vm0, %v333_v23  ;;  %1686 = vmatmul.msk.f32.gmra.mxu2 %vm393_vm0, %v367_v24  ;;  %v353_v23 = vld [vmem:[%s2184_s8 + $0xd8] sm:$0xff] }
  0x73   : > { %1703 = vmatmul.msk.f32.gmra.mxu3 %vm393_vm0, %v384_v31 }
  0x79   : > { %1653 = vmatmul.msk.f32.gmra.mxu0 %vm393_vm0, %v334_v26  ;;  %1687 = vmatmul.msk.f32.gmra.mxu2 %vm393_vm0, %v368_v27  ;;  %v354_v27 = vld [vmem:[%s2184_s8 + $0xe0] sm:$0xff] }
  0x7b   : > { %1704 = vmatmul.msk.f32.gmra.mxu3 %vm393_vm0, %v385_v34 }
  0x81   : > { %1654 = vmatmul.msk.f32.gmra.mxu0 %vm393_vm0, %v335_v29  ;;  %1688 = vmatmul.msk.f32.gmra.mxu2 %vm393_vm0, %v369_v30  ;;  %v374_v29 = vld [vmem:[%s2184_s8 + $0x180] sm:$0xff] }
  0x83   : > { %1705 = vmatmul.msk.f32.gmra.mxu3 %vm393_vm0, %v386_v37  ;;  %v356_v37 = vld [vmem:[%s2184_s8 + $0xf0] sm:$0xff] }
  0x89   : > { %1655 = vmatmul.msk.f32.gmra.mxu0 %vm393_vm0, %v336_v32  ;;  %1689 = vmatmul.msk.f32.gmra.mxu2 %vm393_vm0, %v370_v33  ;;  %v355_v32 = vld [vmem:[%s2184_s8 + $0xe8] sm:$0xff] }
  0x8a   : > { %v375_v33 = vld [vmem:[%s2184_s8 + $0x188] sm:$0xff] }
  0x8b   : > { %1706 = vmatmul.msk.f32.gmra.mxu3 %vm393_vm0, %v387_v40  ;;  %v357_v40 = vld [vmem:[%s2184_s8 + $0xf8] sm:$0xff] }
  0x91   : > { %1656 = vmatmul.msk.f32.gmra.mxu0 %vm393_vm0, %v337_v35  ;;  %1690 = vmatmul.msk.f32.gmra.mxu2 %vm393_vm0, %v371_v36 }
  0x93   : > { %1707 = vmatmul.msk.f32.gmra.mxu3 %vm393_vm0, %v388_v43  ;;  %v358_v43 = vld [vmem:[%s2184_s8 + $0x100] sm:$0xff] }
  0x99   : > { %1657 = vmatmul.msk.f32.gmra.mxu0 %vm393_vm0, %v338_v38  ;;  %1691 = vmatmul.msk.f32.gmra.mxu2 %vm393_vm0, %v372_v39  ;;  %v376_v38 = vld [vmem:[%s2184_s8 + $0x190] sm:$0xff] }
  0x9b   : > { %1708 = vmatmul.msk.f32.gmra.mxu3 %vm393_vm0, %v389_v45 }
  0xa1   : > { %1658 = vmatmul.msk.f32.gmra.mxu0 %vm393_vm0, %v339_v41  ;;  %1692 = vmatmul.msk.f32.gmra.mxu2 %vm393_vm0, %v373_v42 }
  0xa9   : > { %1659 = vmatmul.msk.f32.gmra.mxu0 %vm393_vm0, %v340_v44  ;;  %1693 = vmatmul.msk.f32.gmra.mxu2 %vm393_vm0, %v374_v29 }
  0xb1   : > { %1660 = vmatmul.msk.f32.gmra.mxu0 %vm393_vm0, %v341_v46  ;;  %1694 = vmatmul.msk.f32.gmra.mxu2 %vm393_vm0, %v375_v33  ;;  %v359_v46 = vld [vmem:[%s2184_s8 + $0x108] sm:$0xff] }
  0xb6   : > { %v2305_v47 = vpop.f32.mrf.mxu0 }
  0xb9   : > { %1661 = vmatmul.msk.f32.gmra.mxu0 %vm393_vm0, %v342_v48  ;;  %1695 = vmatmul.msk.f32.gmra.mxu2 %vm393_vm0, %v376_v38  ;;  %v795_v48 = vlaneseq }
  0xbc   : > { %v2309_v49 = vpop.f32.mrf.mxu2 }
  0xbe   : > { %v2311_v50 = vpop.f32.mrf.mxu0  ;;  %v2329_v59 = vpop.f32.mrf.mxu3 }
  0xc1   : > { %1662 = vmatmul.msk.f32.gmra.mxu0 %vm393_vm0, %v343_v51 }
  0xc4   : > { %v2315_v52 = vpop.f32.mrf.mxu2 }
  0xc6   : > { %v2317_v53 = vpop.f32.mrf.mxu0  ;;  %v2340_v1 = vpop.f32.mrf.mxu3 }
  0xc9   : > { %1663 = vmatmul.msk.f32.gmra.mxu0 %vm393_vm0, %v344_v54  ;;  %v2416_v54 = vshrl.u32 %v795_v48, 7 }
  0xcc   : > { %v2321_v55 = vpop.f32.mrf.mxu2 }
  0xce   : > { %v2323_v56 = vpop.f32.mrf.mxu0  ;;  %v2348_v5 = vpop.f32.mrf.mxu3 }
  0xd1   : > { %1664 = vmatmul.msk.f32.gmra.mxu0 %vm393_vm0, %v345_v57 }
  0xd4   : > { %v2327_v58 = vpop.f32.mrf.mxu2 }
  0xd6   : > { %v2331_v60 = vpop.f32.mrf.mxu0  ;;  %v2355_v9 = vpop.f32.mrf.mxu3 }
  0xd9   : > { %1665 = vmatmul.msk.f32.gmra.mxu0 %vm393_vm0, %v346_v61 }
  0xdc   : > { %v2335_v62 = vpop.f32.mrf.mxu2 }
  0xde   : > { %v2337_v63 = vpop.f32.mrf.mxu0  ;;  %v2361_v14 = vpop.f32.mrf.mxu3 }
  0xe1   : > { %1666 = vmatmul.msk.f32.gmra.mxu0 %vm393_vm0, %v347_v0  ;;  %v799_v0 = vadd.s32 24, %v2416_v54 }
  0xe4   : > { %v2343_v2 = vpop.f32.mrf.mxu2 }
  0xe6   : > { %v2345_v3 = vpop.f32.mrf.mxu0  ;;  %v2366_v20 = vpop.f32.mrf.mxu3 }
  0xe9   : > { %1667 = vmatmul.msk.f32.gmra.mxu0 %vm393_vm0, %v348_v4  ;;  %v800_v4 = vadd.s32 32, %v2416_v54 }
  0xec   : > { %v723_v6 = vpop.f32.mrf.mxu2 }
  0xee   : > { %v2351_v7 = vpop.f32.mrf.mxu0  ;;  %v2370_v24 = vpop.f32.mrf.mxu3 }
  0xf1   : > { %1668 = vmatmul.msk.f32.gmra.mxu0 %vm393_vm0, %v349_v8  ;;  %v801_v8 = vadd.s32 40, %v2416_v54 }
  0xf4   : > { %v726_v10 = vpop.f32.mrf.mxu2 }
  0xf6   : > { %v2357_v11 = vpop.f32.mrf.mxu0  ;;  %v2375_v28 = vpop.f32.mrf.mxu3 }
  0xf9   : > { %1669 = vmatmul.msk.f32.gmra.mxu0 %vm393_vm0, %v350_v12  ;;  %v802_v12 = vadd.s32 48, %v2416_v54 }
  0xfc   : > { %v729_v13 = vpop.f32.mrf.mxu2 }
  0xfe   : > { %v630_v15 = vpop.f32.mrf.mxu0  ;;  %v2383_v34 = vpop.f32.mrf.mxu3 }
 0x101   : > { %1670 = vmatmul.msk.f32.gmra.mxu0 %vm393_vm0, %v351_v16  ;;  %v803_v16 = vadd.s32 56, %v2416_v54 }
 0x104   : > { %v732_v17 = vpop.f32.mrf.mxu2 }
 0x106   : > { %v633_v18 = vpop.f32.mrf.mxu0  ;;  %v2390_v41 = vpop.f32.mrf.mxu3 }
 0x109   : > { %1671 = vmatmul.msk.f32.gmra.mxu0 %vm393_vm0, %v352_v19  ;;  %v804_v19 = vadd.s32 64, %v2416_v54 }
 0x10c   : > { %v735_v21 = vpop.f32.mrf.mxu2 }
 0x10e   : > { %v636_v22 = vpop.f32.mrf.mxu0  ;;  %v2397_v44 = vpop.f32.mrf.mxu3 }
 0x111   : > { %1672 = vmatmul.msk.f32.gmra.mxu0 %vm393_vm0, %v353_v23  ;;  %v805_v23 = vadd.s32 72, %v2416_v54 }
 0x114   : > { %v738_v25 = vpop.f32.mrf.mxu2 }
 0x116   : > { %v639_v26 = vpop.f32.mrf.mxu0  ;;  %v2413_v51 = vpop.f32.mrf.mxu3 }
 0x119   : > { %1673 = vmatmul.msk.f32.gmra.mxu0 %vm393_vm0, %v354_v27  ;;  %v806_v27 = vadd.s32 80, %v2416_v54 }
 0x11c   : > { %v741_v30 = vpop.f32.mrf.mxu2 }
 0x11e   : > { %v642_v31 = vpop.f32.mrf.mxu0  ;;  %v2445_v61 = vpop.f32.mrf.mxu3 }
 0x121   : > { %1674 = vmatmul.msk.f32.gmra.mxu0 %vm393_vm0, %v355_v32 }
 0x124   : > { %v744_v35 = vpop.f32.mrf.mxu2 }
 0x125   : > { %1173 = vmatpush.msrb.mxu3 %v744_v35 }
 0x126   : > { %v645_v36 = vpop.f32.mrf.mxu0 }
 0x127   : > { %1174 = vmatpush.msrb.mxu3 %v741_v30 }
 0x129   : > { %1675 = vmatmul.msk.f32.gmra.mxu0 %vm393_vm0, %v356_v37  ;;  %1175 = vmatpush.msrb.mxu3 %v738_v25 }
 0x12b   : > { %1176 = vmatpush.msrb.mxu3 %v735_v21 }
 0x12c   : > { %v2545_v35 = vpop.f32.mrf.mxu2 }
 0x12d   : > { %1177 = vmatpush.msrb.mxu3 %v732_v17 }
 0x12e   : > { %v648_v39 = vpop.f32.mrf.mxu0 }
 0x12f   : > { %1043 = vmatpush.msra.mxu1 %v648_v39  ;;  %1178 = vmatpush.msrb.mxu3 %v729_v13 }
 0x131   : > { %1676 = vmatmul.msk.f32.gmra.mxu0 %vm393_vm0, %v357_v40  ;;  %1044 = vmatpush.msra.mxu1 %v645_v36  ;;  %v808_v36 = vadd.s32 96, %v2416_v54  ;;  %v809_v40 = vadd.s32 104, %v2416_v54 }
 0x132   : > { %1179 = vmatpush.msrb.mxu3 %v726_v10 }
 0x133   : > { %1045 = vmatpush.msra.mxu1 %v642_v31  ;;  %v807_v31 = vadd.s32 88, %v2416_v54 }
 0x134   : > { %1180 = vmatpush.msrb.mxu3 %v723_v6  ;;  %v2554_v39 = vpop.f32.mrf.mxu2 }
 0x135   : > { %1046 = vmatpush.msra.mxu1 %v639_v26 }
 0x136   : > { %v2393_v42 = vpop.f32.mrf.mxu0  ;;  %1181 = vmatpush.msrb.mxu3 %v2343_v2 }
 0x137   : > { %1047 = vmatpush.msra.mxu1 %v636_v22 }
 0x138   : > { %1182 = vmatpush.msrb.mxu3 %v2335_v62  ;;  %v2062_v62 = vmov 1.0  }
 0x139   : > { %1677 = vmatmul.msk.f32.gmra.mxu0 %vm393_vm0, %v358_v43  ;;  %1048 = vmatpush.msra.mxu1 %v633_v18 }
 0x13a   : > { %1183 = vmatpush.msrb.mxu3 %v2327_v58 }
 0x13b   : > { %1049 = vmatpush.msra.mxu1 %v630_v15 }
 0x13c   : > { %1184 = vmatpush.msrb.mxu3 %v2321_v55  ;;  %v2420_v55 = vstv %s1709_s19  ;;  %v2563_v48 = vpop.f32.mrf.mxu2 }
 0x13d   : > { %1050 = vmatpush.msra.mxu1 %v2357_v11  ;;  %v2435_v57 = vadd.s32 %v2420_v55, %v2416_v54  ;;  %v2501_v11 = vadd.s32 %v2420_v55, %v801_v8  ;;  %v2508_v15 = vadd.s32 %v2420_v55, %v802_v12  ;;  %v2515_v18 = vadd.s32 %v2420_v55, %v803_v16 }
 0x13e   : > { %v2404_v45 = vpop.f32.mrf.mxu0  ;;  %1185 = vmatpush.msrb.mxu3 %v2315_v52  ;;  %v2427_v52 = vld [vmem:[%s291_s29] sm:$0xf]  ;;  %v2522_v22 = vadd.s32 %v2420_v55, %v804_v19  ;;  %v2529_v26 = vadd.s32 %v2420_v55, %v805_v23  ;;  %v2536_v30 = vadd.s32 %v2420_v55, %v806_v27  ;;  %v2543_v33 = vadd.s32 %v2420_v55, %v807_v31  ;;  %v1029_v27 = vld [vmem:[%s2191_s13 + $0x10] sm:$0xff] }
 0x13f   : > { %1051 = vmatpush.msra.mxu1 %v2351_v7  ;;  %v2438_v58 = vperm.slane %v2427_v52, 0  ;;  %v2492_v7 = vadd.s32 %v2420_v55, %v800_v4  ;;  %v2552_v38 = vadd.s32 %v2420_v55, %v808_v36  ;;  %v2576_v4 = vperm.slane %v2427_v52, 2 }
 0x140   : > { %1186 = vmatpush.msrb.mxu3 %v2309_v49  ;;  %v811_v8 = vadd.s32 120, %v2416_v54 }
 0x141   : > { %1678 = vmatmul.msk.f32.gmra.mxu0 %vm393_vm0, %v359_v46  ;;  %1052 = vmatpush.msra.mxu1 %v2345_v3  ;;  %vm835_vm1 = vcmp.eq.s32.totalorder %v2438_v58, %v2435_v57  ;;  %v2479_v3 = vadd.s32 %v2420_v55, %v799_v0  ;;  %vm851_vm5 = vcmp.eq.s32.totalorder %v2438_v58, %v2492_v7 }
 0x142   : > { %vm855_vm6 = vcmp.eq.s32.totalorder %v2438_v58, %v2501_v11  ;;  %vm859_vm7 = vcmp.eq.s32.totalorder %v2438_v58, %v2508_v15  ;;  %vm863_vm8 = vcmp.eq.s32.totalorder %v2438_v58, %v2515_v18  ;;  %vm867_vm9 = vcmp.eq.s32.totalorder %v2438_v58, %v2522_v22 }
 0x143   : > { %1053 = vmatpush.msra.mxu1 %v2337_v63  ;;  %vm847_vm4 = vcmp.eq.s32.totalorder %v2438_v58, %v2479_v3  ;;  %vm871_vm10 = vcmp.eq.s32.totalorder %v2438_v58, %v2529_v26  ;;  %vm875_vm11 = vcmp.eq.s32.totalorder %v2438_v58, %v2536_v30  ;;  %vm879_vm12 = vcmp.eq.s32.totalorder %v2438_v58, %v2543_v33 }
 0x144   : > { %vm883_vm13 = vcmp.eq.s32.totalorder %v2438_v58, %v2552_v38  ;;  %v2561_v46 = vadd.s32 %v2420_v55, %v809_v40  ;;  %vm837_vm0 = vcmp.eq.s32.totalorder %v2576_v4, %v2435_v57  ;;  %v2586_v16 = vadd.s32 %v2420_v55, %v811_v8 }
 0x145   : > { %1054 = vmatpush.msra.mxu1 %v2331_v60  ;;  %v797_v60 = vadd.s32 8, %v2416_v54 }
 0x146   : > { %v2430_v49 = vpop.f32.mrf.mxu0  ;;  %vm887_vm14 = vcmp.eq.s32.totalorder %v2438_v58, %v2561_v46 }
 0x147   : > { %1055 = vmatpush.msra.mxu1 %v2323_v56 }
 0x149   : > { %1056 = vmatpush.msra.mxu1 %v2317_v53  ;;  %v2453_v53 = vadd.s32 %v2420_v55, %v797_v60  ;;  %v810_v60 = vadd.s32 112, %v2416_v54 }
 0x14b   : > { %1057 = vmatpush.msra.mxu1 %v2311_v50  ;;  %vm839_vm2 = vcmp.eq.s32.totalorder %v2438_v58, %v2453_v53  ;;  %v798_v50 = vadd.s32 16, %v2416_v54  ;;  %v2573_v0 = vadd.s32 %v2420_v55, %v810_v60  ;;  %v2602_v54 = vperm.slane %v2427_v52, 1 }
 0x14d   : > { %1058 = vmatpush.msra.mxu1 %v2305_v47  ;;  %v2466_v63 = vadd.s32 %v2420_v55, %v798_v50  ;;  %vm891_vm15 = vcmp.eq.s32.totalorder %v2438_v58, %v2573_v0  ;;  %v2605_v55 = vperm.slane %v2427_v52, 3 }
 0x14e   : > { %v2448_v56 = vpop.f32.mrf.mxu0  ;;  %1774 = vmatmul.msk.f32.vlgmr.msra.gmra.mxu1 %vm835_vm1, %v2062_v62  ;;  %vm895_vm1 = vcmp.eq.s32.totalorder %v2438_v58, %v2586_v16 }
 0x14f   : > { %1238 = vmatpush.msrb.mxu1 %v2445_v61  ;;  %vm843_vm3 = vcmp.eq.s32.totalorder %v2438_v58, %v2466_v63 }
 0x151   : > { %1239 = vmatpush.msrb.mxu1 %v2413_v51 }
 0x153   : > { %1240 = vmatpush.msrb.mxu1 %v2397_v44 }
 0x155   : > { %1241 = vmatpush.msrb.mxu1 %v2390_v41 }
 0x156   : > { %v2461_v47 = vpop.f32.mrf.mxu0  ;;  %1775 = vmatmul.msk.f32.gmra.mxu1 %vm839_vm2, %v2062_v62  ;;  %vm841_vm2 = vcmp.eq.s32.totalorder %v2576_v4, %v2453_v53 }
 0x157   : > { %1242 = vmatpush.msrb.mxu1 %v2383_v34 }
 0x159   : > { %1243 = vmatpush.msrb.mxu1 %v2375_v28 }
 0x15b   : > { %1244 = vmatpush.msrb.mxu1 %v2370_v24 }
 0x15d   : > { %1245 = vmatpush.msrb.mxu1 %v2366_v20 }
 0x15e   : > { %v2474_v2 = vpop.f32.mrf.mxu0  ;;  %1776 = vmatmul.msk.f32.gmra.mxu1 %vm843_vm3, %v2062_v62  ;;  %vm836_vm3 = vcmp.eq.s32.totalorder %v2602_v54, %v2435_v57 }
 0x15f   : > { %1246 = vmatpush.msrb.mxu1 %v2361_v14 }
 0x161   : > { %1247 = vmatpush.msrb.mxu1 %v2355_v9 }
 0x163   : > { %1248 = vmatpush.msrb.mxu1 %v2348_v5 }
 0x165   : > { %1249 = vmatpush.msrb.mxu1 %v2340_v1 }
 0x166   : > { %v2487_v6 = vpop.f32.mrf.mxu0  ;;  %1777 = vmatmul.msk.f32.gmra.mxu1 %vm847_vm4, %v2062_v62  ;;  %vm838_vm4 = vcmp.eq.s32.totalorder %v2605_v55, %v2435_v57 }
 0x167   : > { %1250 = vmatpush.msrb.mxu1 %v2329_v59 }
 0x169   : > { %1251 = vmatpush.msrb.mxu1 %v2563_v48 }
 0x16b   : > { %1252 = vmatpush.msrb.mxu1 %v2554_v39 }
 0x16d   : > { %1253 = vmatpush.msrb.mxu1 %v2545_v35 }
 0x16e   : > { %v2497_v10 = vpop.f32.mrf.mxu0  ;;  %1778 = vmatmul.msk.f32.gmra.mxu1 %vm851_vm5, %v2062_v62  ;;  %vm845_vm5 = vcmp.eq.s32.totalorder %v2576_v4, %v2466_v63 }
 0x176   : > { %v675_v13 = vpop.f32.mrf.mxu0  ;;  %1779 = vmatmul.msk.f32.gmra.mxu1 %vm855_vm6, %v2062_v62  ;;  %vm840_vm6 = vcmp.eq.s32.totalorder %v2602_v54, %v2453_v53 }
 0x17e   : > { %v678_v17 = vpop.f32.mrf.mxu0  ;;  %1780 = vmatmul.msk.f32.gmra.mxu1 %vm859_vm7, %v2062_v62  ;;  %vm842_vm7 = vcmp.eq.s32.totalorder %v2605_v55, %v2453_v53 }
 0x186   : > { %v681_v21 = vpop.f32.mrf.mxu0  ;;  %1781 = vmatmul.msk.f32.gmra.mxu1 %vm863_vm8, %v2062_v62  ;;  %vm849_vm8 = vcmp.eq.s32.totalorder %v2576_v4, %v2479_v3 }
 0x18e   : > { %v684_v25 = vpop.f32.mrf.mxu0  ;;  %1782 = vmatmul.msk.f32.gmra.mxu1 %vm867_vm9, %v2062_v62  ;;  %vm844_vm9 = vcmp.eq.s32.totalorder %v2602_v54, %v2466_v63 }
 0x196   : > { %v687_v29 = vpop.f32.mrf.mxu0  ;;  %1783 = vmatmul.msk.f32.gmra.mxu1 %vm871_vm10, %v2062_v62  ;;  %vm846_vm10 = vcmp.eq.s32.totalorder %v2605_v55, %v2466_v63 }
 0x19e   : > { %v690_v32 = vpop.f32.mrf.mxu0  ;;  %1784 = vmatmul.msk.f32.gmra.mxu1 %vm875_vm11, %v2062_v62  ;;  %vm853_vm11 = vcmp.eq.s32.totalorder %v2576_v4, %v2492_v7 }
 0x1a6   : > { %v693_v37 = vpop.f32.mrf.mxu0  ;;  %1785 = vmatmul.msk.f32.gmra.mxu1 %vm879_vm12, %v2062_v62  ;;  %vm848_vm12 = vcmp.eq.s32.totalorder %v2602_v54, %v2479_v3 }
 0x1ae   : > { %v696_v43 = vpop.f32.mrf.mxu0  ;;  %1786 = vmatmul.msk.f32.gmra.mxu1 %vm883_vm13, %v2062_v62  ;;  %vm850_vm13 = vcmp.eq.s32.totalorder %v2605_v55, %v2479_v3  ;;  %v1027_v3 = vld [vmem:[%s2191_s13] sm:$0xff] }
 0x1af   : > { %1108 = vmatpush.msrb.mxu2 %v696_v43 }
 0x1b1   : > { %1109 = vmatpush.msrb.mxu2 %v693_v37  ;;  %v1030_v37 = vld [vmem:[%s2191_s13 + $0x18] sm:$0xff] }
 0x1b3   : > { %1110 = vmatpush.msrb.mxu2 %v690_v32 }
 0x1b5   : > { %1111 = vmatpush.msrb.mxu2 %v687_v29 }
 0x1b6   : > { %v699_v50 = vpop.f32.mrf.mxu0  ;;  %1787 = vmatmul.msk.f32.gmra.mxu1 %vm887_vm14, %v2062_v62  ;;  %vm857_vm14 = vcmp.eq.s32.totalorder %v2576_v4, %v2501_v11 }
 0x1b7   : > { %1112 = vmatpush.msrb.mxu2 %v684_v25 }
 0x1b9   : > { %1113 = vmatpush.msrb.mxu2 %v681_v21 }
 0x1bb   : > { %1114 = vmatpush.msrb.mxu2 %v678_v17  ;;  %v1028_v17 = vld [vmem:[%s2191_s13 + $0x8] sm:$0xff] }
 0x1bd   : > { %1115 = vmatpush.msrb.mxu2 %v675_v13 }
 0x1be   : > { %v702_v12 = vpop.f32.mrf.mxu0  ;;  %1788 = vmatmul.msk.f32.gmra.mxu1 %vm891_vm15, %v2062_v62  ;;  %vm852_vm15 = vcmp.eq.s32.totalorder %v2602_v54, %v2492_v7 }
 0x1bf   : > { %1116 = vmatpush.msrb.mxu2 %v2497_v10  ;;  %1187 = vmatpush.msrb.mxu3 %v702_v12 }
 0x1c1   : > { %1117 = vmatpush.msrb.mxu2 %v2487_v6  ;;  %1188 = vmatpush.msrb.mxu3 %v699_v50  ;;  %v1031_v50 = vld [vmem:[%s2191_s13 + $0x20] sm:$0xff] }
 0x1c2   : > { %1806 = vmatmul.msk.f32.vlgmr.msrb.gmra.mxu3 %vm837_vm0, %v2062_v62  ;;  %vm854_vm0 = vcmp.eq.s32.totalorder %v2605_v55, %v2492_v7 }
 0x1c3   : > { %1867 = vmatpush.msra.mxu3 %v2445_v61  ;;  %1118 = vmatpush.msrb.mxu2 %v2474_v2 }
 0x1c5   : > { %1868 = vmatpush.msra.mxu3 %v2413_v51  ;;  %1119 = vmatpush.msrb.mxu2 %v2461_v47 }
 0x1c6   : > { %1789 = vmatmul.msk.f32.gmra.mxu1 %vm895_vm1, %v2062_v62  ;;  %vm861_vm1 = vcmp.eq.s32.totalorder %v2576_v4, %v2508_v15 }
 0x1c7   : > { %1869 = vmatpush.msra.mxu3 %v2397_v44  ;;  %1120 = vmatpush.msrb.mxu2 %v2448_v56 }
 0x1c9   : > { %1870 = vmatpush.msra.mxu3 %v2390_v41  ;;  %1121 = vmatpush.msrb.mxu2 %v2430_v49 }
 0x1ca   : > { %1807 = vmatmul.msk.f32.gmra.mxu3 %vm841_vm2, %v2062_v62  ;;  %vm856_vm2 = vcmp.eq.s32.totalorder %v2602_v54, %v2501_v11 }
 0x1cb   : > { %1871 = vmatpush.msra.mxu3 %v2383_v34  ;;  %1122 = vmatpush.msrb.mxu2 %v2404_v45  ;;  %v2614_v44 = vpop.f32.mrf.mxu1 }
 0x1cd   : > { %1872 = vmatpush.msra.mxu3 %v2375_v28  ;;  %1123 = vmatpush.msrb.mxu2 %v2393_v42 }
 0x1ce   : > { %1790 = vmatmul.msk.f32.vlgmr.msrb.gmra.mxu2 %vm836_vm3, %v2062_v62  ;;  %1822 = vmatmul.msk.f32.vlgmr.msrb.gmra.mxu1 %vm838_vm4, %v2062_v62  ;;  %vm858_vm3 = vcmp.eq.s32.totalorder %v2605_v55, %v2501_v11  ;;  %vm865_vm4 = vcmp.eq.s32.totalorder %v2576_v4, %v2515_v18 }
 0x1cf   : > { %1873 = vmatpush.msra.mxu3 %v2370_v24 }
 0x1d1   : > { %1874 = vmatpush.msra.mxu3 %v2366_v20 }
 0x1d2   : > { %1808 = vmatmul.msk.f32.gmra.mxu3 %vm845_vm5, %v2062_v62  ;;  %vm860_vm5 = vcmp.eq.s32.totalorder %v2602_v54, %v2508_v15 }
 0x1d3   : > { %1875 = vmatpush.msra.mxu3 %v2361_v14  ;;  %v2630_v28 = vpop.f32.mrf.mxu1 }
 0x1d5   : > { %1876 = vmatpush.msra.mxu3 %v2355_v9 }
 0x1d6   : > { %1791 = vmatmul.msk.f32.gmra.mxu2 %vm840_vm6, %v2062_v62  ;;  %1823 = vmatmul.msk.f32.gmra.mxu1 %vm842_vm7, %v2062_v62  ;;  %vm862_vm6 = vcmp.eq.s32.totalorder %v2605_v55, %v2508_v15  ;;  %vm869_vm7 = vcmp.eq.s32.totalorder %v2576_v4, %v2522_v22 }
 0x1d7   : > { %1877 = vmatpush.msra.mxu3 %v2348_v5 }
 0x1d9   : > { %1878 = vmatpush.msra.mxu3 %v2340_v1 }
 0x1da   : > { %1809 = vmatmul.msk.f32.gmra.mxu3 %vm849_vm8, %v2062_v62  ;;  %vm864_vm8 = vcmp.eq.s32.totalorder %v2602_v54, %v2515_v18 }
 0x1db   : > { %1879 = vmatpush.msra.mxu3 %v2329_v59  ;;  %v2645_v14 = vpop.f32.mrf.mxu1 }
 0x1dd   : > { %1880 = vmatpush.msra.mxu3 %v2563_v48 }
 0x1de   : > { %1792 = vmatmul.msk.f32.gmra.mxu2 %vm844_vm9, %v2062_v62  ;;  %1824 = vmatmul.msk.f32.gmra.mxu1 %vm846_vm10, %v2062_v62  ;;  %vm866_vm9 = vcmp.eq.s32.totalorder %v2605_v55, %v2515_v18  ;;  %vm873_vm10 = vcmp.eq.s32.totalorder %v2576_v4, %v2529_v26 }
 0x1df   : > { %1881 = vmatpush.msra.mxu3 %v2554_v39 }
 0x1e1   : > { %1882 = vmatpush.msra.mxu3 %v2545_v35 }
 0x1e2   : > { %1810 = vmatmul.msk.f32.gmra.mxu3 %vm853_vm11, %v2062_v62  ;;  %vm868_vm11 = vcmp.eq.s32.totalorder %v2602_v54, %v2522_v22 }
 0x1e3   : > { %v2659_v59 = vpop.f32.mrf.mxu1 }
 0x1e6   : > { %1793 = vmatmul.msk.f32.gmra.mxu2 %vm848_vm12, %v2062_v62  ;;  %1825 = vmatmul.msk.f32.gmra.mxu1 %vm850_vm13, %v2062_v62  ;;  %vm870_vm12 = vcmp.eq.s32.totalorder %v2605_v55, %v2522_v22  ;;  %vm877_vm13 = vcmp.eq.s32.totalorder %v2576_v4, %v2536_v30 }
 0x1ea   : > { %1811 = vmatmul.msk.f32.gmra.mxu3 %vm857_vm14, %v2062_v62  ;;  %vm872_vm14 = vcmp.eq.s32.totalorder %v2602_v54, %v2529_v26 }
 0x1eb   : > { %v2670_v1 = vpop.f32.mrf.mxu1 }
 0x1ee   : > { %1794 = vmatmul.msk.f32.gmra.mxu2 %vm852_vm15, %v2062_v62  ;;  %1826 = vmatmul.msk.f32.gmra.mxu1 %vm854_vm0, %v2062_v62  ;;  %vm874_vm15 = vcmp.eq.s32.totalorder %v2605_v55, %v2529_v26  ;;  %vm881_vm0 = vcmp.eq.s32.totalorder %v2576_v4, %v2543_v33 }
 0x1f2   : > { %1812 = vmatmul.msk.f32.gmra.mxu3 %vm861_vm1, %v2062_v62  ;;  %vm876_vm1 = vcmp.eq.s32.totalorder %v2602_v54, %v2536_v30 }
 0x1f3   : > { %v2681_v5 = vpop.f32.mrf.mxu1 }
 0x1f6   : > { %1795 = vmatmul.msk.f32.gmra.mxu2 %vm856_vm2, %v2062_v62  ;;  %1827 = vmatmul.msk.f32.gmra.mxu1 %vm858_vm3, %v2062_v62  ;;  %vm878_vm2 = vcmp.eq.s32.totalorder %v2605_v55, %v2536_v30  ;;  %vm885_vm3 = vcmp.eq.s32.totalorder %v2576_v4, %v2552_v38 }
 0x1fa   : > { %1813 = vmatmul.msk.f32.gmra.mxu3 %vm865_vm4, %v2062_v62  ;;  %vm880_vm4 = vcmp.eq.s32.totalorder %v2602_v54, %v2543_v33 }
 0x1fb   : > { %v2692_v9 = vpop.f32.mrf.mxu1 }
 0x1fe   : > { %1796 = vmatmul.msk.f32.gmra.mxu2 %vm860_vm5, %v2062_v62  ;;  %1828 = vmatmul.msk.f32.gmra.mxu1 %vm862_vm6, %v2062_v62  ;;  %vm882_vm5 = vcmp.eq.s32.totalorder %v2605_v55, %v2543_v33  ;;  %vm889_vm6 = vcmp.eq.s32.totalorder %v2576_v4, %v2561_v46 }
 0x202   : > { %1814 = vmatmul.msk.f32.gmra.mxu3 %vm869_vm7, %v2062_v62  ;;  %vm884_vm7 = vcmp.eq.s32.totalorder %v2602_v54, %v2552_v38 }
 0x203   : > { %v2703_v20 = vpop.f32.mrf.mxu1 }
 0x206   : > { %1797 = vmatmul.msk.f32.gmra.mxu2 %vm864_vm8, %v2062_v62  ;;  %1829 = vmatmul.msk.f32.gmra.mxu1 %vm866_vm9, %v2062_v62  ;;  %vm886_vm8 = vcmp.eq.s32.totalorder %v2605_v55, %v2552_v38  ;;  %vm893_vm9 = vcmp.eq.s32.totalorder %v2576_v4, %v2573_v0 }
 0x20a   : > { %1815 = vmatmul.msk.f32.gmra.mxu3 %vm873_vm10, %v2062_v62  ;;  %vm888_vm10 = vcmp.eq.s32.totalorder %v2602_v54, %v2561_v46 }
 0x20b   : > { %v2714_v24 = vpop.f32.mrf.mxu1 }
 0x20e   : > { %1798 = vmatmul.msk.f32.gmra.mxu2 %vm868_vm11, %v2062_v62  ;;  %1830 = vmatmul.msk.f32.gmra.mxu1 %vm870_vm12, %v2062_v62  ;;  %vm890_vm11 = vcmp.eq.s32.totalorder %v2605_v55, %v2561_v46  ;;  %vm897_vm12 = vcmp.eq.s32.totalorder %v2576_v4, %v2586_v16 }
 0x212   : > { %1816 = vmatmul.msk.f32.gmra.mxu3 %vm877_vm13, %v2062_v62  ;;  %vm892_vm13 = vcmp.eq.s32.totalorder %v2602_v54, %v2573_v0 }
 0x213   : > { %v2725_v34 = vpop.f32.mrf.mxu1 }
 0x216   : > { %1799 = vmatmul.msk.f32.gmra.mxu2 %vm872_vm14, %v2062_v62  ;;  %1831 = vmatmul.msk.f32.gmra.mxu1 %vm874_vm15, %v2062_v62  ;;  %vm894_vm14 = vcmp.eq.s32.totalorder %v2605_v55, %v2573_v0  ;;  %vm896_vm15 = vcmp.eq.s32.totalorder %v2602_v54, %v2586_v16 }
 0x21a   : > { %1817 = vmatmul.msk.f32.gmra.mxu3 %vm881_vm0, %v2062_v62  ;;  %vm898_vm0 = vcmp.eq.s32.totalorder %v2605_v55, %v2586_v16 }
 0x21b   : > { %v2736_v41 = vpop.f32.mrf.mxu1 }
 0x21e   : > { %1800 = vmatmul.msk.f32.gmra.mxu2 %vm876_vm1, %v2062_v62  ;;  %1832 = vmatmul.msk.f32.gmra.mxu1 %vm878_vm2, %v2062_v62 }
 0x222   : > { %1818 = vmatmul.msk.f32.gmra.mxu3 %vm885_vm3, %v2062_v62 }
 0x223   : > { %v2747_v42 = vpop.f32.mrf.mxu1 }
 0x226   : > { %1801 = vmatmul.msk.f32.gmra.mxu2 %vm880_vm4, %v2062_v62  ;;  %1833 = vmatmul.msk.f32.gmra.mxu1 %vm882_vm5, %v2062_v62 }
 0x22a   : > { %1819 = vmatmul.msk.f32.gmra.mxu3 %vm889_vm6, %v2062_v62 }
 0x22b   : > { %v2758_v45 = vpop.f32.mrf.mxu1 }
 0x22e   : > { %1802 = vmatmul.msk.f32.gmra.mxu2 %vm884_vm7, %v2062_v62  ;;  %1834 = vmatmul.msk.f32.gmra.mxu1 %vm886_vm8, %v2062_v62 }
 0x232   : > { %1820 = vmatmul.msk.f32.gmra.mxu3 %vm893_vm9, %v2062_v62 }
 0x233   : > { %v2769_v51 = vpop.f32.mrf.mxu1 }
 0x236   : > { %1803 = vmatmul.msk.f32.gmra.mxu2 %vm888_vm10, %v2062_v62  ;;  %1835 = vmatmul.msk.f32.gmra.mxu1 %vm890_vm11, %v2062_v62 }
 0x23a   : > { %1821 = vmatmul.msk.f32.gmra.mxu3 %vm897_vm12, %v2062_v62 }
 0x23b   : > { %v2780_v52 = vpop.f32.mrf.mxu1 }
 0x23e   : > { %1804 = vmatmul.msk.f32.gmra.mxu2 %vm892_vm13, %v2062_v62 }
 0x242   : > { %1836 = vmatmul.msk.f32.vlgmr.msra.gmra.mxu3 %vm894_vm14, %v2062_v62 }
 0x243   : > { %v2788_v49 = vpop.f32.mrf.mxu1 }
 0x245   : > { %v1190_v57 = vpop.f32.mrf.mxu3 }
 0x246   : > { %1805 = vmatmul.msk.f32.gmra.mxu2 %vm896_vm15, %v2062_v62 }
 0x24a   : > { %1837 = vmatmul.msk.f32.gmra.mxu3 %vm898_vm0, %v2062_v62 }
 0x24b   : > { %v1255_v58 = vpop.f32.mrf.mxu1 }
 0x24d   : > { %v1193_v61 = vpop.f32.mrf.mxu3 }
 0x251   : > { %v1125_v56 = vpop.f32.mrf.mxu2 }
 0x252   : > { %v1126_v53 = vadd.f32 %v1125_v56, %v2614_v44  ;;  %v1032_v44 = vld [vmem:[%s2191_s13 + $0x28] sm:$0xff]  ;;  %v1033_v56 = vld [vmem:[%s2191_s13 + $0x30] sm:$0xff] }
 0x253   : > { %v1258_v47 = vpop.f32.mrf.mxu1 }
 0x254   : > { %v1191_v63 = vadd.f32 %v1190_v57, %v1126_v53 }
 0x255   : > { %v1196_v2 = vpop.f32.mrf.mxu3 }
 0x256   : > { %v1256_v6 = vadd.f32 %v1255_v58, %v1191_v63 }
 0x258   : > { %v1303_v7 = vadd.f32 %v1256_v6, %v1027_v3 }
 0x259   : > { %v1128_v10 = vpop.f32.mrf.mxu2 }
 0x25a   : > { %1319 = vst [vmem:[%s2191_s13] sm:$0xff] %v1303_v7  ;;  %v1129_v11 = vadd.f32 %v1128_v10, %v2630_v28  ;;  %v1034_v7 = vld [vmem:[%s2191_s13 + $0x38] sm:$0xff] }
 0x25b   : > { %v1261_v13 = vpop.f32.mrf.mxu1 }
 0x25c   : > { %v1194_v62 = vadd.f32 %v1193_v61, %v1129_v11 }
 0x25d   : > { %v1199_v15 = vpop.f32.mrf.mxu3 }
 0x25e   : > { %v1259_v18 = vadd.f32 %v1258_v47, %v1194_v62 }
 0x260   : > { %v1304_v19 = vadd.f32 %v1259_v18, %v1028_v17  ;;  %v1035_v18 = vld [vmem:[%s2191_s13 + $0x40] sm:$0xff] }
 0x261   : > { %v1131_v21 = vpop.f32.mrf.mxu2 }
 0x262   : > { %1320 = vst [vmem:[%s2191_s13 + $0x8] sm:$0xff] %v1304_v19  ;;  %v1132_v22 = vadd.f32 %v1131_v21, %v2645_v14 }
 0x263   : > { %v1264_v23 = vpop.f32.mrf.mxu1 }
 0x264   : > { %v1197_v25 = vadd.f32 %v1196_v2, %v1132_v22 }
 0x265   : > { %v1202_v26 = vpop.f32.mrf.mxu3 }
 0x266   : > { %v1262_v29 = vadd.f32 %v1261_v13, %v1197_v25 }
 0x268   : > { %v1305_v30 = vadd.f32 %v1262_v29, %v1029_v27 }
 0x269   : > { %v1134_v31 = vpop.f32.mrf.mxu2 }
 0x26a   : > { %1321 = vst [vmem:[%s2191_s13 + $0x10] sm:$0xff] %v1305_v30  ;;  %v1135_v32 = vadd.f32 %v1134_v31, %v2659_v59 }
 0x26b   : > { %v1267_v33 = vpop.f32.mrf.mxu1 }
 0x26c   : > { %v1200_v35 = vadd.f32 %v1199_v15, %v1135_v32 }
 0x26d   : > { %v1205_v36 = vpop.f32.mrf.mxu3 }
 0x26e   : > { %v1265_v38 = vadd.f32 %v1264_v23, %v1200_v35  ;;  %v1037_v35 = vld [vmem:[%s2191_s13 + $0x50] sm:$0xff] }
 0x270   : > { %v1306_v39 = vadd.f32 %v1265_v38, %v1030_v37 }
 0x271   : > { %v1137_v40 = vpop.f32.mrf.mxu2 }
 0x272   : > { %1322 = vst [vmem:[%s2191_s13 + $0x18] sm:$0xff] %v1306_v39  ;;  %v1138_v43 = vadd.f32 %v1137_v40, %v2670_v1 }
 0x273   : > { %v1270_v46 = vpop.f32.mrf.mxu1 }
 0x274   : > { %v1203_v48 = vadd.f32 %v1202_v26, %v1138_v43  ;;  %v1036_v26 = vld [vmem:[%s2191_s13 + $0x48] sm:$0xff] }
 0x275   : > { %v1208_v60 = vpop.f32.mrf.mxu3 }
 0x276   : > { %v1268_v0 = vadd.f32 %v1267_v33, %v1203_v48 }
 0x278   : > { %v1307_v4 = vadd.f32 %v1268_v0, %v1031_v50 }
 0x279   : > { %v1140_v8 = vpop.f32.mrf.mxu2 }
 0x27a   : > { %1323 = vst [vmem:[%s2191_s13 + $0x20] sm:$0xff] %v1307_v4  ;;  %v1141_v12 = vadd.f32 %v1140_v8, %v2681_v5 }
 0x27b   : > { %v1273_v16 = vpop.f32.mrf.mxu1 }
 0x27c   : > { %v1206_v54 = vadd.f32 %v1205_v36, %v1141_v12  ;;  %v1039_v12 = vld [vmem:[%s2191_s13 + $0x60] sm:$0xff] }
 0x27d   : > { %v1211_v55 = vpop.f32.mrf.mxu3 }
 0x27e   : > { %v1271_v28 = vadd.f32 %v1270_v46, %v1206_v54  ;;  %v1038_v46 = vld [vmem:[%s2191_s13 + $0x58] sm:$0xff] }
 0x280   : > { %v1308_v14 = vadd.f32 %v1271_v28, %v1032_v44 }
 0x281   : > { %v1143_v59 = vpop.f32.mrf.mxu2 }
 0x282   : > { %1324 = vst [vmem:[%s2191_s13 + $0x28] sm:$0xff] %v1308_v14  ;;  %v1144_v1 = vadd.f32 %v1143_v59, %v2692_v9  ;;  %v1040_v59 = vld [vmem:[%s2191_s13 + $0x68] sm:$0xff] }
 0x283   : > { %v1276_v57 = vpop.f32.mrf.mxu1 }
 0x284   : > { %v1209_v58 = vadd.f32 %v1208_v60, %v1144_v1 }
 0x285   : > { %v1214_v61 = vpop.f32.mrf.mxu3 }
 0x286   : > { %v1274_v53 = vadd.f32 %v1273_v16, %v1209_v58 }
 0x288   : > { %v1309_v47 = vadd.f32 %v1274_v53, %v1033_v56  ;;  %v1041_v56 = vld [vmem:[%s2191_s13 + $0x70] sm:$0xff] }
 0x289   : > { %v1146_v5 = vpop.f32.mrf.mxu2 }
 0x28a   : > { %1325 = vst [vmem:[%s2191_s13 + $0x30] sm:$0xff] %v1309_v47  ;;  %v1147_v63 = vadd.f32 %v1146_v5, %v2703_v20 }
 0x28b   : > { %v1279_v2 = vpop.f32.mrf.mxu1 }
 0x28c   : > { %v1212_v3 = vadd.f32 %v1211_v55, %v1147_v63 }
 0x28d   : > { %v1217_v6 = vpop.f32.mrf.mxu3 }
 0x28e   : > { %v1277_v10 = vadd.f32 %v1276_v57, %v1212_v3  ;;  %v1042_v3 = vld [vmem:[%s2191_s13 + $0x78] sm:$0xff] }
 0x290   : > { %v1310_v9 = vadd.f32 %v1277_v10, %v1034_v7 }
 0x291   : > { %v1149_v11 = vpop.f32.mrf.mxu2 }
 0x292   : > { %1326 = vst [vmem:[%s2191_s13 + $0x38] sm:$0xff] %v1310_v9  ;;  %v1150_v13 = vadd.f32 %v1149_v11, %v2714_v24 }
 0x293   : > { %v1282_v62 = vpop.f32.mrf.mxu1 }
 0x294   : > { %v1215_v15 = vadd.f32 %v1214_v61, %v1150_v13 }
 0x295   : > { %v1220_v17 = vpop.f32.mrf.mxu3 }
 0x296   : > { %v1280_v19 = vadd.f32 %v1279_v2, %v1215_v15 }
 0x298   : > { %v1311_v20 = vadd.f32 %v1280_v19, %v1035_v18 }
 0x299   : > { %v1152_v21 = vpop.f32.mrf.mxu2 }
 0x29a   : > { %1327 = vst [vmem:[%s2191_s13 + $0x40] sm:$0xff] %v1311_v20  ;;  %v1153_v22 = vadd.f32 %v1152_v21, %v2725_v34 }
 0x29b   : > { %v1285_v27 = vpop.f32.mrf.mxu1 }
 0x29c   : > { %v1218_v23 = vadd.f32 %v1217_v6, %v1153_v22 }
 0x29d   : > { %v1223_v25 = vpop.f32.mrf.mxu3 }
 0x29e   : > { %v1283_v29 = vadd.f32 %v1282_v62, %v1218_v23 }
 0x2a0   : > { %v1312_v24 = vadd.f32 %v1283_v29, %v1036_v26 }
 0x2a1   : > { %v1155_v30 = vpop.f32.mrf.mxu2 }
 0x2a2   : > { %1328 = vst [vmem:[%s2191_s13 + $0x48] sm:$0xff] %v1312_v24  ;;  %v1156_v31 = vadd.f32 %v1155_v30, %v2736_v41 }
 0x2a3   : > { %v1288_v37 = vpop.f32.mrf.mxu1 }
 0x2a4   : > { %v1221_v32 = vadd.f32 %v1220_v17, %v1156_v31 }
 0x2a5   : > { %v1226_v33 = vpop.f32.mrf.mxu3 }
 0x2a6   : > { %v1286_v36 = vadd.f32 %v1285_v27, %v1221_v32 }
 0x2a8   : > { %v1313_v34 = vadd.f32 %v1286_v36, %v1037_v35 }
 0x2a9   : > { %v1158_v38 = vpop.f32.mrf.mxu2 }
 0x2aa   : > { %1329 = vst [vmem:[%s2191_s13 + $0x50] sm:$0xff] %v1313_v34  ;;  %v1159_v39 = vadd.f32 %v1158_v38, %v2747_v42 }
 0x2ab   : > { %v1291_v50 = vpop.f32.mrf.mxu1 }
 0x2ac   : > { %v1224_v40 = vadd.f32 %v1223_v25, %v1159_v39 }
 0x2ad   : > { %v1229_v43 = vpop.f32.mrf.mxu3 }
 0x2ae   : > { %v1289_v48 = vadd.f32 %v1288_v37, %v1224_v40 }
 0x2b0   : > { %v1314_v60 = vadd.f32 %v1289_v48, %v1038_v46 }
 0x2b1   : > { %v1161_v41 = vpop.f32.mrf.mxu2 }
 0x2b2   : > { %1330 = vst [vmem:[%s2191_s13 + $0x58] sm:$0xff] %v1314_v60  ;;  %v1162_v0 = vadd.f32 %v1161_v41, %v2758_v45 }
 0x2b3   : > { %v1294_v44 = vpop.f32.mrf.mxu1 }
 0x2b4   : > { %v1227_v4 = vadd.f32 %v1226_v33, %v1162_v0 }
 0x2b5   : > { %v1232_v8 = vpop.f32.mrf.mxu3 }
 0x2b6   : > { %v1292_v16 = vadd.f32 %v1291_v50, %v1227_v4 }
 0x2b8   : > { %v1315_v54 = vadd.f32 %v1292_v16, %v1039_v12 }
 0x2b9   : > { %v1164_v42 = vpop.f32.mrf.mxu2 }
 0x2ba   : > { %1331 = vst [vmem:[%s2191_s13 + $0x60] sm:$0xff] %v1315_v54  ;;  %v1165_v55 = vadd.f32 %v1164_v42, %v2769_v51 }
 0x2bc   : > { %v1230_v28 = vadd.f32 %v1229_v43, %v1165_v55 }
 0x2bd   : > { %v1235_v14 = vpop.f32.mrf.mxu3 }
 0x2be   : > { %v1295_v1 = vadd.f32 %v1294_v44, %v1230_v28 }
 0x2c0   : > { %v1316_v57 = vadd.f32 %v1295_v1, %v1040_v59 }
 0x2c1   : > { %v1167_v45 = vpop.f32.mrf.mxu2 }
 0x2c2   : > { %1332 = vst [vmem:[%s2191_s13 + $0x68] sm:$0xff] %v1316_v57  ;;  %v1168_v58 = vadd.f32 %v1167_v45, %v2780_v52 }
 0x2c4   : > { %v1233_v61 = vadd.f32 %v1232_v8, %v1168_v58 }
 0x2c5   : > { %v1297_v53 = vpop.f32.mrf.mxu3 }
 0x2c6   : > { %v1298_v47 = vadd.f32 %v1297_v53, %v1233_v61 }
 0x2c8   : > { %v1317_v5 = vadd.f32 %v1298_v47, %v1041_v56 }
 0x2c9   : > { %v1170_v63 = vpop.f32.mrf.mxu2 }
 0x2ca   : > { %1333 = vst [vmem:[%s2191_s13 + $0x70] sm:$0xff] %v1317_v5  ;;  %v1171_v51 = vadd.f32 %v1170_v63, %v2788_v49 }
 0x2cc   : > { %v1236_v2 = vadd.f32 %v1235_v14, %v1171_v51 }
 0x2cd   : > { %v1300_v6 = vpop.f32.mrf.mxu3 }
 0x2ce   : > { %v1301_v7 = vadd.f32 %v1300_v6, %v1236_v2  ;;  %1338 = sbr.rel (%p1838_p2) target bundleno = 889 (0x379), region = 52 }
 0x2d0   : > { %v1318_v10 = vadd.f32 %v1301_v7, %v1042_v3 }
 0x2d2   : > { %1334 = vst [vmem:[%s2191_s13 + $0x78] sm:$0xff] %v1318_v10 }
 0x2d3   : > { %v1372_v52 = vld [vmem:[%s2984_s4 + $0x8] sm:$0xff]  ;;  %v1371_v49 = vld [vmem:[%s2984_s4] sm:$0xff]  ;;  %vm1377_vm1 = vcmask 130048   ;;  %v1365_v20 = vld [vmem:[%s2189_s26 + $0x50] sm:$0xff] }
 0x2d4   : > { %1884 = vmatpush.msra.mxu2 %v1372_v52  ;;  %1885 = vmatpush.msra.mxu3 %v1372_v52  ;;  %v1363_v9 = vld [vmem:[%s2189_s26 + $0x40] sm:$0xff]  ;;  %v1364_v15 = vld [vmem:[%s2189_s26 + $0x48] sm:$0xff]  ;;  %v1369_v21 = vld [vmem:[%s2189_s26 + $0x70] sm:$0xff] }
 0x2d5   : > { %v1367_v11 = vld [vmem:[%s2189_s26 + $0x60] sm:$0xff]  ;;  %1440 = vmatpush.msra.mxu0 %v1372_v52  ;;  %1883 = vmatpush.msra.mxu1 %v1372_v52  ;;  %v1368_v17 = vld [vmem:[%s2189_s26 + $0x68] sm:$0xff]  ;;  %v1357_v22 = vld [vmem:[%s2189_s26 + $0x10] sm:$0xff] }
 0x2d6   : > { %1887 = vmatpush.msra.mxu2 %v1371_v49  ;;  %1888 = vmatpush.msra.mxu3 %v1371_v49  ;;  %v1355_v13 = vld [vmem:[%s2189_s26] sm:$0xff]  ;;  %v1356_v18 = vld [vmem:[%s2189_s26 + $0x8] sm:$0xff]  ;;  %v1361_v23 = vld [vmem:[%s2189_s26 + $0x30] sm:$0xff] }
 0x2d7   : > { %v1359_v62 = vld [vmem:[%s2189_s26 + $0x20] sm:$0xff]  ;;  %1847 = vmatmul.msk.f32.vlgmr.msra.gmra.mxu2 %vm1377_vm1, %v1363_v9  ;;  %1851 = vmatmul.msk.f32.vlgmr.msra.gmra.mxu3 %vm1377_vm1, %v1367_v11  ;;  %v1360_v19 = vld [vmem:[%s2189_s26 + $0x28] sm:$0xff]  ;;  %v1366_v25 = vld [vmem:[%s2189_s26 + $0x58] sm:$0xff] }
 0x2d8   : > { %1441 = vmatpush.msra.mxu0 %v1371_v49  ;;  %1886 = vmatpush.msra.mxu1 %v1371_v49  ;;  %v1370_v26 = vld [vmem:[%s2189_s26 + $0x78] sm:$0xff]  ;;  %v2884_v24 = vld [vmem:[%s2985_s5] ss:$0 sm:$0xff]  ;;  %v1340_v50 = vld [vmem:[%s2191_s13 + $0x8] sm:$0xff] }
 0x2d9   : > { %1839 = vmatmul.msk.f32.vlgmr.msra.gmra.mxu0 %vm1377_vm1, %v1355_v13  ;;  %1843 = vmatmul.msk.f32.vlgmr.msra.gmra.mxu1 %vm1377_vm1, %v1359_v62  ;;  %v1358_v27 = vld [vmem:[%s2189_s26 + $0x18] sm:$0xff]  ;;  %v1339_v30 = vld [vmem:[%s2191_s13] sm:$0xff]  ;;  %v1344_v4 = vld [vmem:[%s2191_s13 + $0x28] sm:$0xff] }
 0x2da   : > { %v1362_v29 = vld [vmem:[%s2189_s26 + $0x38] sm:$0xff]  ;;  %v1343_v32 = vld [vmem:[%s2191_s13 + $0x20] sm:$0xff]  ;;  %v1348_v55 = vld [vmem:[%s2191_s13 + $0x48] sm:$0xff] }
 0x2db   : > { %v1347_v38 = vld [vmem:[%s2191_s13 + $0x40] sm:$0xff]  ;;  %v1352_v28 = vld [vmem:[%s2191_s13 + $0x68] sm:$0xff]  ;;  %v1341_v58 = vld [vmem:[%s2191_s13 + $0x10] sm:$0xff] }
 0x2dc   : > { %v1351_v40 = vld [vmem:[%s2191_s13 + $0x60] sm:$0xff]  ;;  %v1345_v56 = vld [vmem:[%s2191_s13 + $0x30] sm:$0xff]  ;;  %v1342_v11 = vld [vmem:[%s2191_s13 + $0x18] sm:$0xff] }
 0x2dd   : > { %v1349_v2 = vld [vmem:[%s2191_s13 + $0x50] sm:$0xff]  ;;  %v1346_v62 = vld [vmem:[%s2191_s13 + $0x38] sm:$0xff] }
 0x2de   : > { %v1353_v6 = vld [vmem:[%s2191_s13 + $0x70] sm:$0xff] }
 0x2df   : > { %1848 = vmatmul.msk.f32.gmra.mxu2 %vm1377_vm1, %v1364_v15  ;;  %1852 = vmatmul.msk.f32.gmra.mxu3 %vm1377_vm1, %v1368_v17 }
 0x2e1   : > { %1840 = vmatmul.msk.f32.gmra.mxu0 %vm1377_vm1, %v1356_v18  ;;  %1844 = vmatmul.msk.f32.gmra.mxu1 %vm1377_vm1, %v1360_v19 }
 0x2e7   : > { %1849 = vmatmul.msk.f32.gmra.mxu2 %vm1377_vm1, %v1365_v20  ;;  %1853 = vmatmul.msk.f32.gmra.mxu3 %vm1377_vm1, %v1369_v21  ;;  %v1350_v21 = vld [vmem:[%s2191_s13 + $0x58] sm:$0xff] }
 0x2e9   : > { %1841 = vmatmul.msk.f32.gmra.mxu0 %vm1377_vm1, %v1357_v22  ;;  %1845 = vmatmul.msk.f32.gmra.mxu1 %vm1377_vm1, %v1361_v23  ;;  %v1354_v23 = vld [vmem:[%s2191_s13 + $0x78] sm:$0xff] }
 0x2ef   : > { %1850 = vmatmul.msk.f32.gmra.mxu2 %vm1377_vm1, %v1366_v25  ;;  %1854 = vmatmul.msk.f32.gmra.mxu3 %vm1377_vm1, %v1370_v26 }
 0x2f1   : > { %1842 = vmatmul.msk.f32.gmra.mxu0 %vm1377_vm1, %v1358_v27  ;;  %1846 = vmatmul.msk.f32.gmra.mxu1 %vm1377_vm1, %v1362_v29 }
 0x356   : > { %v1443_v31 = vpop.f32.mrf.mxu0  ;;  %v1455_v33 = vpop.f32.mrf.mxu1 }
 0x357   : > { %v1444_v35 = vadd.f32 %v2884_v24, %v1443_v31  ;;  %v1456_v36 = vadd.f32 %v2884_v24, %v1455_v33 }
 0x359   : > { %v1491_v37 = vadd.f32 %v1444_v35, %v1339_v30  ;;  %v1495_v34 = vadd.f32 %v1456_v36, %v1343_v32 }
 0x35a   : > { %v1467_v39 = vpop.f32.mrf.mxu2  ;;  %v1479_v43 = vpop.f32.mrf.mxu3 }
 0x35b   : > { %1507 = vst [vmem:[%s2191_s13] sm:$0xff] %v1491_v37  ;;  %v1468_v46 = vadd.f32 %v2884_v24, %v1467_v39  ;;  %v1480_v48 = vadd.f32 %v2884_v24, %v1479_v43 }
 0x35c   : > { %1511 = vst [vmem:[%s2191_s13 + $0x20] sm:$0xff] %v1495_v34 }
 0x35d   : > { %v1499_v60 = vadd.f32 %v1468_v46, %v1347_v38  ;;  %v1503_v41 = vadd.f32 %v1480_v48, %v1351_v40 }
 0x35e   : > { %v1446_v0 = vpop.f32.mrf.mxu0  ;;  %v1458_v8 = vpop.f32.mrf.mxu1 }
 0x35f   : > { %1515 = vst [vmem:[%s2191_s13 + $0x40] sm:$0xff] %v1499_v60  ;;  %v1447_v12 = vadd.f32 %v2884_v24, %v1446_v0  ;;  %v1459_v16 = vadd.f32 %v2884_v24, %v1458_v8 }
 0x360   : > { %1519 = vst [vmem:[%s2191_s13 + $0x60] sm:$0xff] %v1503_v41 }
 0x361   : > { %v1492_v54 = vadd.f32 %v1447_v12, %v1340_v50  ;;  %v1496_v42 = vadd.f32 %v1459_v16, %v1344_v4 }
 0x362   : > { %v1470_v44 = vpop.f32.mrf.mxu2  ;;  %v1482_v14 = vpop.f32.mrf.mxu3 }
 0x363   : > { %1508 = vst [vmem:[%s2191_s13 + $0x8] sm:$0xff] %v1492_v54  ;;  %v1471_v59 = vadd.f32 %v2884_v24, %v1470_v44  ;;  %v1483_v1 = vadd.f32 %v2884_v24, %v1482_v14 }
 0x364   : > { %1512 = vst [vmem:[%s2191_s13 + $0x28] sm:$0xff] %v1496_v42 }
 0x365   : > { %v1500_v57 = vadd.f32 %v1471_v59, %v1348_v55  ;;  %v1504_v45 = vadd.f32 %v1483_v1, %v1352_v28 }
 0x366   : > { %v1449_v61 = vpop.f32.mrf.mxu0  ;;  %v1461_v53 = vpop.f32.mrf.mxu1 }
 0x367   : > { %1516 = vst [vmem:[%s2191_s13 + $0x48] sm:$0xff] %v1500_v57  ;;  %v1450_v47 = vadd.f32 %v2884_v24, %v1449_v61  ;;  %v1462_v5 = vadd.f32 %v2884_v24, %v1461_v53 }
 0x368   : > { %1520 = vst [vmem:[%s2191_s13 + $0x68] sm:$0xff] %v1504_v45 }
 0x369   : > { %v1493_v63 = vadd.f32 %v1450_v47, %v1341_v58  ;;  %v1497_v51 = vadd.f32 %v1462_v5, %v1345_v56 }
 0x36a   : > { %v1473_v3 = vpop.f32.mrf.mxu2  ;;  %v1485_v7 = vpop.f32.mrf.mxu3 }
 0x36b   : > { %1509 = vst [vmem:[%s2191_s13 + $0x10] sm:$0xff] %v1493_v63  ;;  %v1474_v10 = vadd.f32 %v2884_v24, %v1473_v3  ;;  %v1486_v52 = vadd.f32 %v2884_v24, %v1485_v7 }
 0x36c   : > { %1513 = vst [vmem:[%s2191_s13 + $0x30] sm:$0xff] %v1497_v51 }
 0x36d   : > { %v1501_v49 = vadd.f32 %v1474_v10, %v1349_v2  ;;  %v1505_v9 = vadd.f32 %v1486_v52, %v1353_v6 }
 0x36e   : > { %v1452_v13 = vpop.f32.mrf.mxu0  ;;  %v1464_v15 = vpop.f32.mrf.mxu1 }
 0x36f   : > { %1517 = vst [vmem:[%s2191_s13 + $0x50] sm:$0xff] %v1501_v49  ;;  %v1453_v17 = vadd.f32 %v2884_v24, %v1452_v13  ;;  %v1465_v18 = vadd.f32 %v2884_v24, %v1464_v15 }
 0x370   : > { %1521 = vst [vmem:[%s2191_s13 + $0x70] sm:$0xff] %v1505_v9 }
 0x371   : > { %v1494_v19 = vadd.f32 %v1453_v17, %v1342_v11  ;;  %v1498_v20 = vadd.f32 %v1465_v18, %v1346_v62 }
 0x372   : > { %v1476_v22 = vpop.f32.mrf.mxu2  ;;  %v1488_v25 = vpop.f32.mrf.mxu3 }
 0x373   : > { %1510 = vst [vmem:[%s2191_s13 + $0x18] sm:$0xff] %v1494_v19  ;;  %v1477_v26 = vadd.f32 %v2884_v24, %v1476_v22  ;;  %v1489_v27 = vadd.f32 %v2884_v24, %v1488_v25 }
 0x374   : > { %1514 = vst [vmem:[%s2191_s13 + $0x38] sm:$0xff] %v1498_v20 }
 0x375   : > { %v1502_v29 = vadd.f32 %v1477_v26, %v1350_v21  ;;  %v1506_v30 = vadd.f32 %v1489_v27, %v1354_v23 }
 0x377   : > { %1518 = vst [vmem:[%s2191_s13 + $0x58] sm:$0xff] %v1502_v29 }
 0x378   : > { %1522 = vst [vmem:[%s2191_s13 + $0x78] sm:$0xff] %v1506_v30 }
 0x379 PF: > { %s1535_s7 = scalar_lea.hbm %s2986_s6, %s1709_s19  ;;  %s1536_s14 = sshll.u32 %s2191_s13, 4  ;;  %s1537_s14 = int_to_ptr.vmem [resolvable:$true] %s1536_s14 }
 0x37a   : > { %s1538_s16 = sshll.u32 %s1535_s7, 4  ;;  %s2998_s17 = sand.u32 1, %s2035_s22   ;;  %s1539_s16 = int_to_ptr.hbm [resolvable:$true] %s1538_s16 }
 0x37b   : > { %s1524_s18 = scalar_lea.sflag [#allocation3], %s2998_s17  ;;  %s1979_s8 = sshra.s32 %s1539_s16, 4  ;;  %s1980_s8 = int_to_ptr.hbm [resolvable:$true] %s1979_s8 }
 0x37c   : > { %s1981_s20 = scalar_lea.hbm %s1980_s8, 128  ;;  %s1985_s29 = scalar_lea.hbm %s2986_s6, 256 }
 0x37d   : > { %p1982_p4 = scmp.ne.s32.totalorder %s1980_s8, %s1981_s20  ;;  %p1986_p7 = scmp.lt.s32.totalorder %s1980_s8, %s2986_s6 }
 0x37e   : > { %p1987_p8 = scmp.lt.s32.totalorder %s1985_s29, %s1981_s20 }
 0x37f   : > { %p1983_p5 = pnand %p1982_p4, %p2149_p3 }
 0x380   : > { %p1988_p10 = por %p1987_p8, %p1986_p7 }
 0x381   : > { %p1984_p6 = pneg %p1983_p5 }
 0x383   : > { %p1989_p11 = pnand %p1988_p10, %p1984_p6 }
 0x385   : > { %1992 = shalt.err (!%p1989_p11)
}
 0x386   : > { %s2063_s13 = smov 128   ;;  %s2064_s19 = smov 8  }
 0x387   : > { %1889 = dma.vmem_to_hbm [thread:$0]  (%p2149_p3), %s1537_s14, 2048, %s1539_s16, %s1524_s18, %s2063_s13, %s2063_s13, %s2064_s19  }
 0x388 PF: > { %p1895_p12 = scmp.ge.s32.totalorder %s2059_s28, 2  ;;  %s1553_s24 = sand.u32 1, %s2031_s21  }
 0x389   : > { %s1554_s12 = scalar_lea.sflag [#allocation3], %s1553_s24 }
 0x38a   : > { %p1892_p13 = pnand %p1895_p12, %p2159_p9 }
 0x38c   : > { %p1893_p0 = pneg %p1892_p13 }
 0x38e   : > { %2026 = dma.done.wait (%p1893_p0), %s1554_s12, 2048  }
 0x38f   : > { %2028 = vsyncadd (%p1893_p0), %s1554_s12, 4294965248  ;;  %s19_s28 = sadd.s32 1, %s2059_s28   ;;  %s2999_s26 = sld [smem:[#allocation9_spill]] }
 0x390   : > { %p16_p1 = scmp.ge.s32.totalorder %s19_s28, 6   ;;  %s3000_s24 = sld [smem:[#allocation5_spill]] }
 0x391   : > { %s3001_s25 = sld [smem:[#allocation6_spill]]  ;;  %s3004_s21 = smov %s2035_s22 }
 0x392   : > { %s3002_s9 = sld [smem:[#allocation7_spill]]  ;;  %s3005_s22 = smov %s2039_s23 }
 0x393   : > { %s3003_s27 = sld [smem:[#allocation8_spill]] }
 0x394   :  { %18 = sbr.rel (!%p16_p1) target bundleno = 5 (0x5), region = 93 }
 0x395   : > { %s3006_s23 = smov %s2999_s26 }
 0x398   : > { %s3007_s26 = smov %s3002_s9 }
 0x399   :  { %1560 = vsyncpa [#allocation3], 1 }
 0x39a   :  { %1562 = vsyncpa [#allocation3 + $0x1], 1 }

</bundles_post_ra>
